<compile_context>
chip_gen: v5e
topology: v5e:2x2
jax: 0.10.0
libtpu: 0.0.40
codegen_flags: <defaults>
</compile_context>

<pallas_src>
import functools

import numpy as np
import jax
import jax.numpy as jnp
from jax.experimental import pallas as pl
from jax.experimental.pallas import tpu as pltpu


# ---------------------------------------------------------------------------
# Pallas kernels
# ---------------------------------------------------------------------------
def _psd_kernel(seg_ref, fc_ref, fs_ref, psd_ref, *, chans, nseg_pad):
    """Welch PSD (mean average) for one frequency tile.

    Window, constant detrend and density/one-sided scaling are pre-folded into fc/fs, so the
    kernel is just: power = (segs @ fc)^2 + (segs @ fs)^2, summed over segments per channel.
    (The 1/nseg factor — with the *true* nseg — is applied in the wrapper; zero-padded segments
    contribute exactly zero power.)
    """
    segs = seg_ref[...]                                                   # (C*Sp, P) bf16
    re = jnp.dot(segs, fc_ref[...], preferred_element_type=jnp.float32)   # (C*Sp, tf) f32
    im = jnp.dot(segs, fs_ref[...], preferred_element_type=jnp.float32)   # (C*Sp, tf) f32
    power = re * re + im * im                                             # (C*Sp, tf)
    tf = power.shape[-1]
    # nseg_pad is a multiple of 8, so the reshape stays on (8,128) tile boundaries and the
    # reduction is a clean sublane (XLU) sum — no relayout slices, no concatenate copies.
    psd_ref[...] = jnp.sum(power.reshape(chans, nseg_pad, tf), axis=1)    # (C, tf)


def _whiten_kernel(x_ref, fwd_ref, hw_ref, o_ref, acc_ref):
    """Frequency-domain whitening, tiled over the (merged re|im) frequency axis.

    Grid is (half, freq_tile): the leading axis splits the frequency tiles in two halves
    ("parallel", one per TensorCore on v7x); the trailing axis is the reduction ("arbitrary").

    Per tile: z = x @ fwd_tile ; y = z * h2w_tile ; acc += fwd_tile @ y.T
    The irfft weights (w/n) are pre-folded into h2w, so the single streamed fwd tile serves both
    the forward and the inverse transform (half the HBM traffic of a separate inverse basis).
    acc is an (Np_pad, C_pad) f32 VMEM accumulator; the finalize transposes it once so the HBM
    output store stays lane-dense (C_pad, Np_pad).
    """
    k = pl.program_id(1)

    @pl.when(k == 0)
    def _():
        acc_ref[...] = jnp.zeros_like(acc_ref)

    fwd = fwd_ref[...]                                                       # (Np, tf) bf16
    z = jnp.dot(x_ref[...], fwd, preferred_element_type=jnp.float32)         # (Cp, tf) f32
    y = z * hw_ref[...]                                                       # (Cp, tf) f32
    yt = y.T.astype(jnp.bfloat16)                                             # (tf, Cp) — tiny transpose
    acc_ref[...] += jnp.dot(fwd, yt, preferred_element_type=jnp.float32)      # (Np, Cp) f32

    @pl.when(k == pl.num_programs(1) - 1)
    def _():
        o_ref[0] = acc_ref[...].T                                             # (Cp, Np) lane-dense


# ---------------------------------------------------------------------------
# Generation-aware VMEM / tile sizing
# ---------------------------------------------------------------------------
def _round_up(x, m):
    return ((x + m - 1) // m) * m


def _tpu_vmem_capacity():
    try:
        info = pltpu.get_tpu_info()
        cap = getattr(info, "vmem_capacity_bytes", None)
        if cap:
            return int(cap)
    except Exception:
        pass
    return 64 << 20      # conservative fallback (safe on v7x as well as v5e/v6e)


def _vmem_budgets():
    """Return (vmem_limit ceiling, tile budget) for the current TPU generation."""
    cap = _tpu_vmem_capacity()
    # never request physical capacity: leave headroom for Mosaic internal scratch / output
    # double buffering.  128 MiB chips -> ~105 MiB ceiling; 64 MiB chips -> 48 MiB ceiling.
    ceiling = max(32 << 20, min(cap - (16 << 20), int(cap * 0.82)))
    budget = max(24 << 20, ceiling - (8 << 20))
    return ceiling, budget


def _compiler_params(vmem_bytes, semantics, ceiling):
    limit = int(min(max(vmem_bytes + (8 << 20), 32 << 20), ceiling))
    return pltpu.CompilerParams(dimension_semantics=semantics, vmem_limit_bytes=limit)


def _choose_whiten_tile(np_pad, c_pad, f2, budget):
    cap = max(128, _round_up(f2, 128) // 2)          # keep zero-padding modest at small N
    fixed = (np_pad * 128 * 4                        # (Np, Cp) f32 accumulator (lane-padded)
             + 2 * c_pad * np_pad * 2                # x block (bf16), double-buffered
             + 2 * c_pad * np_pad * 4)               # output block (f32), double-buffered
    for tf in (512, 256, 128):
        if tf > cap:
            continue
        per = (2 * np_pad * tf * 2                   # fwd tile (bf16), double-buffered
               + 2 * c_pad * tf * 4                  # h2w tile (f32), double-buffered
               + 4 * c_pad * tf * 4)                 # z / y f32 temporaries
        if fixed + per <= budget:
            return tf
    # Minimum lane tile; at sizes where even this overshoots, the Cooley–Tukey TODO is the fix.
    return 128


def _whiten_vmem_bytes(np_pad, c_pad, tf):
    return (np_pad * 128 * 4 + 2 * c_pad * np_pad * 2 + 2 * c_pad * np_pad * 4
            + 2 * np_pad * tf * 2 + 2 * c_pad * tf * 4 + 4 * c_pad * tf * 4)


def _choose_psd_tile(rows, p, chans, budget):
    fixed = 2 * rows * p * 2                         # segs (bf16), double-buffered worst case
    for tf in (512, 256, 128):
        per = (2 * 2 * p * tf * 2                    # fc/fs tiles (bf16), double-buffered
               + 3 * rows * tf * 4                   # re / im / power f32 intermediates
               + 2 * chans * tf * 4)                 # output tile
        if fixed + per <= budget:
            return tf
    return 128


def _psd_vmem_bytes(rows, p, chans, tf):
    return 2 * rows * p * 2 + 2 * 2 * p * tf * 2 + 3 * rows * tf * 4 + 2 * chans * tf * 4


# ---------------------------------------------------------------------------
# pallas_call wrappers (grid / BlockSpec / compiler params)
# ---------------------------------------------------------------------------
def pallas_psd(segs, fcw, fsw, chans, nseg_pad, tf, ceiling):
    rows, p = segs.shape
    fp_pad = fcw.shape[1]
    kern = functools.partial(_psd_kernel, chans=chans, nseg_pad=nseg_pad)
    vmem = _psd_vmem_bytes(rows, p, chans, tf)
    return pl.pallas_call(
        kern,
        out_shape=jax.ShapeDtypeStruct((chans, fp_pad), jnp.float32),
        grid_spec=pltpu.PrefetchScalarGridSpec(
            num_scalar_prefetch=0,
            grid=(fp_pad // tf,),
            in_specs=[
                pl.BlockSpec((rows, p), lambda k: (0, 0)),
                pl.BlockSpec((p, tf), lambda k: (0, k)),
                pl.BlockSpec((p, tf), lambda k: (0, k)),
            ],
            out_specs=pl.BlockSpec((chans, tf), lambda k: (0, k)),
        ),
        compiler_params=_compiler_params(vmem, ("parallel",), ceiling),
    )(segs, fcw, fsw)


def pallas_whiten(x, hw, fwd, tf, ceiling):
    c_pad, np_pad = x.shape
    f2_pad = fwd.shape[1]
    n_half = f2_pad // tf // 2          # frequency tiles per half (f2_pad is a multiple of 2*tf)
    vmem = _whiten_vmem_bytes(np_pad, c_pad, tf)
    parts = pl.pallas_call(
        _whiten_kernel,
        out_shape=jax.ShapeDtypeStruct((2, c_pad, np_pad), jnp.float32),
        grid_spec=pltpu.PrefetchScalarGridSpec(
            num_scalar_prefetch=0,
            grid=(2, n_half),
            in_specs=[
                pl.BlockSpec((c_pad, np_pad), lambda h, k: (0, 0)),           # x (constant)
                pl.BlockSpec((np_pad, tf), lambda h, k: (0, h * n_half + k)),  # fwd = [cos | -sin]
                pl.BlockSpec((c_pad, tf), lambda h, k: (0, h * n_half + k)),   # h2w = [h*w/n | h*w/n]
            ],
            out_specs=pl.BlockSpec((1, c_pad, np_pad), lambda h, k: (h, 0, 0)),
            scratch_shapes=[pltpu.VMEM((np_pad, c_pad), jnp.float32)],
        ),
        compiler_params=_compiler_params(vmem, ("parallel", "arbitrary"), ceiling),
    )(x, fwd, hw)
    # two partial sums (one per TensorCore on v7x); the add is a tiny XLA op
    return parts[0] + parts[1]


# ---------------------------------------------------------------------------
# Host-side (numpy, float64) construction of windows and DFT bases.
# int64 modular products avoid the int32 twiddle overflow at large N.
# ---------------------------------------------------------------------------
def _hann_np(m):
    # torch.hann_window(m) default (periodic=True)
    n = np.arange(m, dtype=np.float64)
    return 0.5 * (1.0 - np.cos(2.0 * np.pi * n / m))


def _rdft_np(n):
    # rfft(x)[k] = sum_t x[t] * (cos(2*pi*t*k/n) - i*sin(2*pi*t*k/n))
    nf = n // 2 + 1
    t = np.arange(n, dtype=np.int64)
    k = np.arange(nf, dtype=np.int64)
    tk = (t[:, None] * k[None, :]) % n
    ang = 2.0 * np.pi * tk.astype(np.float64) / n
    return np.cos(ang), -np.sin(ang)                 # (n, nf) each


def _irdft_weights_np(n):
    # one-sided irfft weights: x[t] = sum_k (w_k / n) * (Re X_k cos - Im X_k sin)
    nf = n // 2 + 1
    w = np.full((nf,), 2.0, dtype=np.float64)
    w[0] = 1.0
    if n % 2 == 0:
        w[-1] = 1.0
    return w / n


def _to_bf16(a):
    return jnp.asarray(a, dtype=jnp.float32).astype(jnp.bfloat16)


# ---------------------------------------------------------------------------
# BatchWhitener
# ---------------------------------------------------------------------------
class BatchWhitener:
    """JAX/Pallas port of the aframe BatchWhitener: Welch PSD of the background segment,
    fduration-truncated inverse-ASD whitening of the live segment, then unfold into
    `batch_size` inference kernels."""

    def __init__(self, kernel_length, sample_rate, inference_sampling_rate,
                 batch_size, fduration, fftlength=2.0, highpass=None):
        self.sample_rate = float(sample_rate)
        self.stride_size = int(sample_rate / inference_sampling_rate)
        self.kernel_size = int(kernel_length * sample_rate)
        length = (batch_size - 1) / inference_sampling_rate
        length += kernel_length + fduration
        self.size = int(length * sample_rate)
        self.highpass = highpass
        self.c_pad = 8                                # pad channels to one native sublane tile

        self.vmem_ceiling, self.tile_budget = _vmem_budgets()

        # ---- SpectralDensity(sample_rate, fftlength, overlap=None, average="mean") ----
        p = int(fftlength * sample_rate)
        self.nperseg = p
        self.nstride = p // 2                        # overlap=None -> 50% overlap
        fp = p // 2 + 1
        self.nfreq_psd = fp
        self.fp_pad = _round_up(fp, 512)             # 512-multiple so tf in {128,256,512} divides

        win = _hann_np(p)
        fc, fs = _rdft_np(p)
        # fold constant detrend (subtract segment mean) + Hann window into the basis columns
        fc_w = win[:, None] * fc - (win @ fc)[None, :] / p
        fs_w = win[:, None] * fs - (win @ fs)[None, :] / p
        # fold density scaling + one-sided doubling (sqrt, since the kernel squares)
        scale = 1.0 / (self.sample_rate * np.sum(win ** 2))
        bw = np.full((fp,), 2.0, dtype=np.float64)
        bw[0] = 1.0
        if p % 2 == 0:
            bw[-1] = 1.0
        col = np.sqrt(bw * scale)[None, :]
        fc_w = fc_w * col
        fs_w = fs_w * col
        fcw = np.zeros((p, self.fp_pad), dtype=np.float64)
        fsw = np.zeros((p, self.fp_pad), dtype=np.float64)
        fcw[:, :fp] = fc_w
        fsw[:, :fp] = fs_w
        self.psd_fcw = _to_bf16(fcw)
        self.psd_fsw = _to_bf16(fsw)

        # ---- Whitener(fduration, sample_rate, highpass) ----
        self.pad = int(fduration * sample_rate / 2)
        n = self.size
        fx = n // 2 + 1
        self.nfreq_x = fx
        self.np_pad = _round_up(n, 128)

        f2 = 2 * fx
        self.wh_tf = _choose_whiten_tile(self.np_pad, self.c_pad, f2, self.tile_budget)
        self.f2_pad = _round_up(f2, 2 * self.wh_tf)   # divisible by 2*tf (two parallel halves)

        # Single merged forward basis [cos | -sin]; the inverse transform reuses it with the
        # one-sided irfft weights folded into the whitening filter (see _whiten_kernel).
        wfc, wfs = _rdft_np(n)
        fwd = np.zeros((self.np_pad, self.f2_pad), dtype=np.float64)
        fwd[:n, :fx] = wfc
        fwd[:n, fx:f2] = wfs
        self.wh_fwd = _to_bf16(fwd)
        self.inv_w = jnp.asarray(_irdft_weights_np(n), dtype=jnp.float32)   # (fx,) = w/n

        self.taper = jnp.asarray(_hann_np(2 * self.pad), dtype=jnp.float32)

    def __call__(self, x):
        # x: (1, num_ifos, T) float32 with T > self.size
        fs = self.sample_rate
        split = x.shape[-1] - self.size
        background = x[0, :, :split]                 # (C, Tb)
        data = x[0, :, split:]                       # (C, N)
        c = background.shape[0]
        assert c <= self.c_pad

        # ---- SpectralDensity (Welch, mean average) -- Pallas kernel ----
        nseg = (split - self.nperseg) // self.nstride + 1
        nseg_pad = _round_up(nseg, 8)                # zero segments contribute zero power
        idx = (jnp.arange(nseg) * self.nstride)[:, None] + jnp.arange(self.nperseg)[None, :]
        segs = background[:, idx]                                        # (C, nseg, P)
        segs = jnp.pad(segs, ((0, 0), (0, nseg_pad - nseg), (0, 0)))
        segs = segs.reshape(c * nseg_pad, self.nperseg).astype(jnp.bfloat16)
        psd_tf = _choose_psd_tile(c * nseg_pad, self.nperseg, c, self.tile_budget)
        psd = pallas_psd(segs, self.psd_fcw, self.psd_fsw, c, nseg_pad, psd_tf,
                         self.vmem_ceiling)
        psd = psd[:, :self.nfreq_psd] * (1.0 / nseg)             # crop padding, mean over segments
        # TODO(synk): ml4gw's `fast_spectral_density` low-frequency approximation (fast=True when
        # highpass is set) is not reproduced; standard Welch-mean is used, the difference is
        # removed by the highpass anyway.

        # ---- Whiten: fduration-truncated inverse-ASD filter (small setup, plain JAX) ----
        n = self.size
        pad = self.pad
        freqs_psd = jnp.arange(self.nfreq_psd, dtype=jnp.float32) * fs / self.nperseg
        freqs_x = jnp.arange(self.nfreq_x, dtype=jnp.float32) * fs / n
        psd_i = jax.vmap(lambda row: jnp.interp(freqs_x, freqs_psd, row))(psd)   # (C, Fx)
        # TODO(synk): ml4gw interpolates the PSD with F.interpolate(mode="linear"); jnp.interp
        # over frequency (align_corners=True semantics) is used here.
        inv_asd = 1.0 / jnp.sqrt(psd_i)
        if self.highpass is not None:
            inv_asd = jnp.where(freqs_x[None, :] >= self.highpass, inv_asd, 0.0)
        q = jnp.fft.irfft(inv_asd, n=n, axis=-1)                 # time-domain response
        q = q.at[:, :pad].multiply(self.taper[pad:])             # taper + truncate to fduration
        q = q.at[:, n - pad:].multiply(self.taper[:pad])
        q = q.at[:, pad:n - pad].set(0.0)
        h = jnp.fft.rfft(q, n=n, axis=-1).real.astype(jnp.float32)   # real: q is even-symmetric
        h = h * jnp.sqrt(jnp.float32(2.0 / fs))                  # unit-variance whitening norm
        hw = h * self.inv_w[None, :]                             # fold irfft weights w/n into h
        h2w = jnp.concatenate([hw, hw], axis=-1)                 # filter for [re | im] halves
        h2w = jnp.pad(h2w, ((0, self.c_pad - c), (0, self.f2_pad - 2 * self.nfreq_x)))

        # ---- apply whitening filter in the frequency domain -- Pallas kernel ----
        x_pad = jnp.pad(data.astype(jnp.bfloat16),
                        ((0, self.c_pad - c), (0, self.np_pad - n)))
        white = pallas_whiten(x_pad, h2w, self.wh_fwd, self.wh_tf, self.vmem_ceiling)
        white = white[:c]                                        # (C, Np_pad) f32

        # ---- crop fduration/2 edges fused into unfold_windows(x, K, stride)[:, 0] ----
        nw = (n - 2 * pad - self.kernel_size) // self.stride_size + 1
        widx = ((jnp.arange(nw) * self.stride_size)[:, None]
                + jnp.arange(self.kernel_size)[None, :] + pad)
        out = white[:, widx]                                     # (C, nw, K)
        return jnp.transpose(out, (1, 0, 2))                     # (nw = batch_size, C, K)


# ---------------------------------------------------------------------------
if __name__ == "__main__":
    sample_rate = 64.0
    num_ifos = 2
    batch_size = 4

    whitener = BatchWhitener(
        kernel_length=1.0,
        sample_rate=sample_rate,
        inference_sampling_rate=8.0,
        batch_size=batch_size,
        fduration=1.0,
        fftlength=2.0,
        highpass=8.0,
    )

    background_len = 4 * int(sample_rate)          # 256 samples of PSD background
    total_len = background_len + whitener.size     # 256 + 152 = 408

    key = jax.random.PRNGKey(0)
    x = jax.random.normal(key, (1, num_ifos, total_len), dtype=jnp.float32)

    out = jax.jit(whitener.__call__)(x)
    out = jax.block_until_ready(out)

    assert out.shape == (batch_size, num_ifos, whitener.kernel_size), out.shape
    assert bool(jnp.all(jnp.isfinite(out)))
    print("KERNEL_OK")
</pallas_src>

<mosaic_0001>
module attributes {stable_mosaic.version = 11 : i64} {
  func.func @_psd_kernel(%arg0: i32, %arg1: memref<16x128xbf16, #tpu.memory_space<vmem>>, %arg2: memref<128x512xbf16, #tpu.memory_space<vmem>>, %arg3: memref<128x512xbf16, #tpu.memory_space<vmem>>, %arg4: memref<2x512xf32, #tpu.memory_space<vmem>>) attributes {dimension_semantics = [#tpu.dimension_semantics<parallel>], iteration_bounds = array<i64: 1>, scalar_prefetch = 0 : i64, scratch_operands = 0 : i64, tpu.core_type = #tpu.core_type<tc>, window_params = [{pipeline_mode = #tpu.pipeline_mode<synchronous>, transform_indices = @transform_0, window_bounds = array<i64: 16, 128>}, {transform_indices = @transform_1, window_bounds = array<i64: 128, 512>}, {transform_indices = @transform_2, window_bounds = array<i64: 128, 512>}, {transform_indices = @transform_3, window_bounds = array<i64: 2, 512>}]} {
    %c0 = arith.constant 0 : index
    %c0_0 = arith.constant 0 : index
    %0 = vector.load %arg1[%c0, %c0_0] : memref<16x128xbf16, #tpu.memory_space<vmem>>, vector<16x128xbf16>
    %c0_1 = arith.constant 0 : index
    %c0_2 = arith.constant 0 : index
    %1 = vector.load %arg2[%c0_1, %c0_2] : memref<128x512xbf16, #tpu.memory_space<vmem>>, vector<128x512xbf16>
    %cst = arith.constant dense<0.000000e+00> : vector<16x512xf32>
    %2 = tpu.matmul %0, %1, %cst {dimension_numbers = #tpu.dot_dimension_numbers<[1], [0], [0], [1], [0, 0, 1, 1], [], []>} : vector<16x128xbf16>, vector<128x512xbf16>, vector<16x512xf32> -> vector<16x512xf32>
    %c0_3 = arith.constant 0 : index
    %c0_4 = arith.constant 0 : index
    %3 = vector.load %arg3[%c0_3, %c0_4] : memref<128x512xbf16, #tpu.memory_space<vmem>>, vector<128x512xbf16>
    %cst_5 = arith.constant dense<0.000000e+00> : vector<16x512xf32>
    %4 = tpu.matmul %0, %3, %cst_5 {dimension_numbers = #tpu.dot_dimension_numbers<[1], [0], [0], [1], [0, 0, 1, 1], [], []>} : vector<16x128xbf16>, vector<128x512xbf16>, vector<16x512xf32> -> vector<16x512xf32>
    %5 = arith.mulf %2, %2 : vector<16x512xf32>
    %6 = arith.mulf %4, %4 : vector<16x512xf32>
    %7 = arith.addf %5, %6 : vector<16x512xf32>
    %8 = vector.shape_cast %7 : vector<16x512xf32> to vector<2x8x512xf32>
    %cst_6 = arith.constant dense<0.000000e+00> : vector<2x512xf32>
    %9 = vector.multi_reduction <add>, %8, %cst_6 [1] : vector<2x8x512xf32> to vector<2x512xf32>
    %c0_7 = arith.constant 0 : index
    %c0_8 = arith.constant 0 : index
    %10 = vector.load %arg4[%c0_7, %c0_8] : memref<2x512xf32, #tpu.memory_space<vmem>>, vector<2x512xf32>
    tpu.vector_store %arg4[%c0_7, %c0_8], %9 {strides = array<i32>} : memref<2x512xf32, #tpu.memory_space<vmem>>, vector<2x512xf32>,
    return
  }
  func.func @transform_0(%arg0: i32) -> (i32, i32) {
    %c0_i32 = arith.constant 0 : i32
    %c0_i32_0 = arith.constant 0 : i32
    %c0_i32_1 = arith.constant 0 : i32
    return %c0_i32, %c0_i32_0 : i32, i32
  }
  func.func @transform_1(%arg0: i32) -> (i32, i32) {
    %c0_i32 = arith.constant 0 : i32
    %c0_i32_0 = arith.constant 0 : i32
    return %c0_i32, %arg0 : i32, i32
  }
  func.func @transform_2(%arg0: i32) -> (i32, i32) {
    %c0_i32 = arith.constant 0 : i32
    %c0_i32_0 = arith.constant 0 : i32
    return %c0_i32, %arg0 : i32, i32
  }
  func.func @transform_3(%arg0: i32) -> (i32, i32) {
    %c0_i32 = arith.constant 0 : i32
    %c0_i32_0 = arith.constant 0 : i32
    return %c0_i32, %arg0 : i32, i32
  }
}

module attributes {stable_mosaic.version = 11 : i64} {
  func.func @_whiten_kernel(%arg0: i32, %arg1: i32, %arg2: memref<8x256xbf16, #tpu.memory_space<vmem>>, %arg3: memref<256x128xbf16, #tpu.memory_space<vmem>>, %arg4: memref<8x128xf32, #tpu.memory_space<vmem>>, %arg5: memref<1x8x256xf32, #tpu.memory_space<vmem>>, %arg6: memref<256x8xf32, #tpu.memory_space<vmem>>) attributes {dimension_semantics = [#tpu.dimension_semantics<parallel>, #tpu.dimension_semantics<arbitrary>], iteration_bounds = array<i64: 2, 1>, scalar_prefetch = 0 : i64, scratch_operands = 1 : i64, tpu.core_type = #tpu.core_type<tc>, window_params = [{pipeline_mode = #tpu.pipeline_mode<synchronous>, transform_indices = @transform_0, window_bounds = array<i64: 8, 256>}, {transform_indices = @transform_1, window_bounds = array<i64: 256, 128>}, {transform_indices = @transform_2, window_bounds = array<i64: 8, 128>}, {transform_indices = @transform_3, window_bounds = array<i64: 1, 8, 256>}]} {
    %c0_i32 = arith.constant 0 : i32
    %0 = arith.cmpi eq, %arg1, %c0_i32 : i32
    %1 = arith.extui %0 : i1 to i32
    %c0_i32_0 = arith.constant 0 : i32
    %2 = arith.cmpi ne, %1, %c0_i32_0 : i32
    scf.if %2 {
      %cst_13 = arith.constant 0.000000e+00 : f32
      %17 = vector.broadcast %cst_13 : f32 to vector<256x8xf32>
      %c0_14 = arith.constant 0 : index
      %c0_15 = arith.constant 0 : index
      %18 = vector.load %arg6[%c0_14, %c0_15] : memref<256x8xf32, #tpu.memory_space<vmem>>, vector<256x8xf32>
      tpu.vector_store %arg6[%c0_14, %c0_15], %17 {strides = array<i32>} : memref<256x8xf32, #tpu.memory_space<vmem>>, vector<256x8xf32>,
    } else {
    }
    %c0 = arith.constant 0 : index
    %c0_1 = arith.constant 0 : index
    %3 = vector.load %arg3[%c0, %c0_1] : memref<256x128xbf16, #tpu.memory_space<vmem>>, vector<256x128xbf16>
    %c0_2 = arith.constant 0 : index
    %c0_3 = arith.constant 0 : index
    %4 = vector.load %arg2[%c0_2, %c0_3] : memref<8x256xbf16, #tpu.memory_space<vmem>>, vector<8x256xbf16>
    %cst = arith.constant dense<0.000000e+00> : vector<8x128xf32>
    %5 = tpu.matmul %4, %3, %cst {dimension_numbers = #tpu.dot_dimension_numbers<[1], [0], [0], [1], [0, 0, 1, 1], [], []>} : vector<8x256xbf16>, vector<256x128xbf16>, vector<8x128xf32> -> vector<8x128xf32>
    %c0_4 = arith.constant 0 : index
    %c0_5 = arith.constant 0 : index
    %6 = vector.load %arg4[%c0_4, %c0_5] : memref<8x128xf32, #tpu.memory_space<vmem>>, vector<8x128xf32>
    %7 = arith.mulf %5, %6 : vector<8x128xf32>
    %8 = tpu.transpose %7, [1, 0] : vector<8x128xf32> -> vector<128x8xf32>
    %9 = arith.truncf %8 : vector<128x8xf32> to vector<128x8xbf16>
    %c0_6 = arith.constant 0 : index
    %c0_7 = arith.constant 0 : index
    %10 = vector.load %arg6[%c0_6, %c0_7] : memref<256x8xf32, #tpu.memory_space<vmem>>, vector<256x8xf32>
    %cst_8 = arith.constant dense<0.000000e+00> : vector<256x8xf32>
    %11 = tpu.matmul %3, %9, %cst_8 {dimension_numbers = #tpu.dot_dimension_numbers<[1], [0], [0], [1], [0, 0, 1, 1], [], []>} : vector<256x128xbf16>, vector<128x8xbf16>, vector<256x8xf32> -> vector<256x8xf32>
    %12 = arith.addf %10, %11 : vector<256x8xf32>
    %c0_9 = arith.constant 0 : index
    %c0_10 = arith.constant 0 : index
    %13 = vector.load %arg6[%c0_9, %c0_10] : memref<256x8xf32, #tpu.memory_space<vmem>>, vector<256x8xf32>
    tpu.vector_store %arg6[%c0_9, %c0_10], %12 {strides = array<i32>} : memref<256x8xf32, #tpu.memory_space<vmem>>, vector<256x8xf32>,
    %c0_i32_11 = arith.constant 0 : i32
    %14 = arith.cmpi eq, %arg1, %c0_i32_11 : i32
    %15 = arith.extui %14 : i1 to i32
    %c0_i32_12 = arith.constant 0 : i32
    %16 = arith.cmpi ne, %15, %c0_i32_12 : i32
    scf.if %16 {
      %c0_13 = arith.constant 0 : index
      %c0_14 = arith.constant 0 : index
      %17 = vector.load %arg6[%c0_13, %c0_14] : memref<256x8xf32, #tpu.memory_space<vmem>>, vector<256x8xf32>
      %18 = tpu.transpose %17, [1, 0] : vector<256x8xf32> -> vector<8x256xf32>
      %c0_15 = arith.constant 0 : index
      %c0_16 = arith.constant 0 : index
      %c0_17 = arith.constant 0 : index
      %19 = vector.load %arg5[%c0_15, %c0_16, %c0_17] : memref<1x8x256xf32, #tpu.memory_space<vmem>>, vector<1x8x256xf32>
      %20 = vector.shape_cast %19 : vector<1x8x256xf32> to vector<8x256xf32>
      %21 = vector.shape_cast %18 : vector<8x256xf32> to vector<1x8x256xf32>
      tpu.vector_store %arg5[%c0_15, %c0_16, %c0_17], %21 {strides = array<i32>} : memref<1x8x256xf32, #tpu.memory_space<vmem>>, vector<1x8x256xf32>,
    } else {
    }
    return
  }
  func.func @transform_0(%arg0: i32, %arg1: i32) -> (i32, i32) {
    %c0_i32 = arith.constant 0 : i32
    %c0_i32_0 = arith.constant 0 : i32
    %c0_i32_1 = arith.constant 0 : i32
    return %c0_i32, %c0_i32_0 : i32, i32
  }
  func.func @transform_1(%arg0: i32, %arg1: i32) -> (i32, i32) {
    %c1_i32 = arith.constant 1 : i32
    %0 = arith.muli %arg0, %c1_i32 : i32
    %1 = arith.addi %0, %arg1 : i32
    %c0_i32 = arith.constant 0 : i32
    %c0_i32_0 = arith.constant 0 : i32
    return %c0_i32, %1 : i32, i32
  }
  func.func @transform_2(%arg0: i32, %arg1: i32) -> (i32, i32) {
    %c1_i32 = arith.constant 1 : i32
    %0 = arith.muli %arg0, %c1_i32 : i32
    %1 = arith.addi %0, %arg1 : i32
    %c0_i32 = arith.constant 0 : i32
    %c0_i32_0 = arith.constant 0 : i32
    return %c0_i32, %1 : i32, i32
  }
  func.func @transform_3(%arg0: i32, %arg1: i32) -> (i32, i32, i32) {
    %c0_i32 = arith.constant 0 : i32
    %c0_i32_0 = arith.constant 0 : i32
    %c0_i32_1 = arith.constant 0 : i32
    return %arg0, %c0_i32, %c0_i32_0 : i32, i32, i32
  }
}

</mosaic_0001>

<bundles_post_ra>
// kernel: custom-call.1
= control target key start
LH: loop header
LB: loop body
LE: loop exit
PB: predicated region body
PF: predicated region fallthrough
CT: control target
= control target key end

     0   :  { %s6_s0 = inlined_call_operand.vmem [shape: u32[77], index: 0, kind: output, shape index: {}]  }

// kernel: reverse.1
= control target key start
LH: loop header
LB: loop body
LE: loop exit
PB: predicated region body
PF: predicated region fallthrough
CT: control target
= control target key end

     0   :  { %v81_v10 = vlaneseq  ;;  %v199_v46 = vld [vmem:[#allocation0 + $0x7] ss:$-1 sm:$0xff]  ;;  %s399_s0 = inlined_call_operand.vmem [shape: f32[2,75], index: 0, kind: input, shape index: {}]   ;;  %s400_s1 = inlined_call_operand.vmem [shape: f32[2,75], index: 1, kind: output, shape index: {}]  }
   0x1   :  { %v49_v0 = vld [vmem:[%s399_s0] sm:$0xff]  ;;  %v51_v1 = vld [vmem:[%s399_s0 + $0x8] sm:$0xff]  ;;  %v53_v2 = vld [vmem:[%s399_s0 + $0x10] sm:$0xff]  ;;  %v200_v50 = vrot.slane %v199_v46, 5 }
   0x2   :  { %50 = vst [vmem:[#allocation0 + $0x8] sm:$0xff] %v49_v0  ;;  %v55_v3 = vld [vmem:[%s399_s0 + $0x18] sm:$0xff]  ;;  %v57_v4 = vld [vmem:[%s399_s0 + $0x20] sm:$0xff]  ;;  %v59_v5 = vld [vmem:[%s399_s0 + $0x28] sm:$0xff]  ;;  %v346_v11 = vshrl.u32 %v81_v10, 7 }
   0x3   :  { %52 = vst [vmem:[#allocation0 + $0x10] sm:$0xff] %v51_v1  ;;  %v61_v6 = vld [vmem:[%s399_s0 + $0x30] sm:$0xff]  ;;  %v63_v7 = vld [vmem:[%s399_s0 + $0x38] sm:$0xff]  ;;  %v65_v8 = vld [vmem:[%s399_s0 + $0x40] sm:$0xff] }
   0x4   :  { %54 = vst [vmem:[#allocation0 + $0x18] sm:$0xff] %v53_v2  ;;  %v67_v9 = vld [vmem:[%s399_s0 + $0x48] sm:$0xff]  ;;  %vm83_vm0 = vcmp.lt.s32.totalorder %v346_v11, 3 }
   0x5   :  { %56 = vst [vmem:[#allocation0 + $0x20] sm:$0xff] %v55_v3 }
   0x6   :  { %58 = vst [vmem:[#allocation0 + $0x28] sm:$0xff] %v57_v4 }
   0x7   :  { %60 = vst [vmem:[#allocation0 + $0x30] sm:$0xff] %v59_v5 }
   0x8   :  { %62 = vst [vmem:[#allocation0 + $0x38] sm:$0xff] %v61_v6 }
   0x9   :  { %64 = vst [vmem:[#allocation0 + $0x40] sm:$0xff] %v63_v7  ;;  %v186_v42 = vld [vmem:[#allocation0 + $0xf] ss:$-1 sm:$0xff] }
   0xa   :  { %66 = vst [vmem:[#allocation0 + $0x48] sm:$0xff] %v65_v8  ;;  %v172_v38 = vld [vmem:[#allocation0 + $0x17] ss:$-1 sm:$0xff]  ;;  %v187_v47 = vrot.slane %v186_v42, 5  ;;  %v204_v48 = vld [vmem:[#allocation0 + $0xf] ss:$-1 sm:$0xff] }
   0xb   :  { %68 = vst [vmem:[#allocation0 + $0x50] sm:$0xff] %v67_v9  ;;  %v158_v34 = vld [vmem:[#allocation0 + $0x1f] ss:$-1 sm:$0xff]  ;;  %v173_v43 = vrot.slane %v172_v38, 5  ;;  %v191_v44 = vld [vmem:[#allocation0 + $0x17] ss:$-1 sm:$0xff] }
   0xc   :  { %v144_v30 = vld [vmem:[#allocation0 + $0x27] ss:$-1 sm:$0xff]  ;;  %v159_v39 = vrot.slane %v158_v34, 5  ;;  %v177_v40 = vld [vmem:[#allocation0 + $0x1f] ss:$-1 sm:$0xff]  ;;  %v192_v49 = vrot.slane %v191_v44, 5 }
   0xd   :  { %v130_v26 = vld [vmem:[#allocation0 + $0x2f] ss:$-1 sm:$0xff]  ;;  %v145_v35 = vrot.slane %v144_v30, 5  ;;  %v163_v36 = vld [vmem:[#allocation0 + $0x27] ss:$-1 sm:$0xff]  ;;  %v178_v45 = vrot.slane %v177_v40, 5 }
   0xe   :  { %v116_v13 = vld [vmem:[#allocation0 + $0x37] ss:$-1 sm:$0xff]  ;;  %v131_v31 = vrot.slane %v130_v26, 5  ;;  %v149_v32 = vld [vmem:[#allocation0 + $0x2f] ss:$-1 sm:$0xff]  ;;  %v164_v41 = vrot.slane %v163_v36, 5 }
   0xf   :  { %v102_v12 = vld [vmem:[#allocation0 + $0x3f] ss:$-1 sm:$0xff]  ;;  %v117_v27 = vrot.slane %v116_v13, 5  ;;  %v135_v28 = vld [vmem:[#allocation0 + $0x37] ss:$-1 sm:$0xff]  ;;  %v150_v37 = vrot.slane %v149_v32, 5 }
  0x10   :  { %v88_v14 = vld [vmem:[#allocation0 + $0x47] ss:$-1 sm:$0xff]  ;;  %v103_v15 = vrot.slane %v102_v12, 5  ;;  %v121_v17 = vld [vmem:[#allocation0 + $0x3f] ss:$-1 sm:$0xff]  ;;  %v136_v33 = vrot.slane %v135_v28, 5 }
  0x11   :  { %v107_v16 = vld [vmem:[#allocation0 + $0x47] ss:$-1 sm:$0xff]  ;;  %v74_v18 = vld [vmem:[#allocation0 + $0x4f] ss:$-1 sm:$0xff]  ;;  %v89_v19 = vrot.slane %v88_v14, 5  ;;  %v122_v29 = vrot.slane %v121_v17, 5 }
  0x12   :  { %v93_v20 = vld [vmem:[#allocation0 + $0x4f] ss:$-1 sm:$0xff]  ;;  %v75_v21 = vrot.slane %v74_v18, 5  ;;  %v79_v22 = vld [vmem:[#allocation0 + $0x57] ss:$-1 sm:$0xff]  ;;  %104 = vst [vmem:[#allocation1 + $0x10] sm:$0xff] %v103_v15 }
  0x13   :  { %v94_v23 = vrot.slane %v93_v20, 5  ;;  %v80_v24 = vrot.slane %v79_v22, 5  ;;  %90 = vst [vmem:[#allocation1 + $0x8] sm:$0xff] %v89_v19  ;;  %v108_v25 = vrot.slane %v107_v16, 5  ;;  %v205_v51 = vrot.slane %v204_v48, 5 }
  0x14   :  { %76 = vst [vmem:[#allocation1] sm:$0xff] %v75_v21 }
  0x15   :  { %84 = vst.msk [vmem:[#allocation1] sm:$0xff] %vm83_vm0, %v80_v24 }
  0x16   :  { %98 = vst.msk [vmem:[#allocation1 + $0x8] sm:$0xff] %vm83_vm0, %v94_v23 }
  0x17   :  { %112 = vst.msk [vmem:[#allocation1 + $0x10] sm:$0xff] %vm83_vm0, %v108_v25 }
  0x18   :  { %118 = vst [vmem:[#allocation1 + $0x18] sm:$0xff] %v117_v27 }
  0x19   :  { %126 = vst.msk [vmem:[#allocation1 + $0x18] sm:$0xff] %vm83_vm0, %v122_v29 }
  0x1a   :  { %132 = vst [vmem:[#allocation1 + $0x20] sm:$0xff] %v131_v31 }
  0x1b   :  { %140 = vst.msk [vmem:[#allocation1 + $0x20] sm:$0xff] %vm83_vm0, %v136_v33 }
  0x1c   :  { %146 = vst [vmem:[#allocation1 + $0x28] sm:$0xff] %v145_v35  ;;  %v256_v52 = vld [vmem:[#allocation1] sm:$0xff] }
  0x1d   :  { %154 = vst.msk [vmem:[#allocation1 + $0x28] sm:$0xff] %vm83_vm0, %v150_v37  ;;  %v258_v53 = vld [vmem:[#allocation1 + $0x8] sm:$0xff] }
  0x1e   :  { %160 = vst [vmem:[#allocation1 + $0x30] sm:$0xff] %v159_v39  ;;  %v260_v54 = vld [vmem:[#allocation1 + $0x10] sm:$0xff] }
  0x1f   :  { %168 = vst.msk [vmem:[#allocation1 + $0x30] sm:$0xff] %vm83_vm0, %v164_v41 }
  0x20   :  { %174 = vst [vmem:[#allocation1 + $0x38] sm:$0xff] %v173_v43  ;;  %v262_v55 = vld [vmem:[#allocation1 + $0x18] sm:$0xff] }
  0x21   :  { %182 = vst.msk [vmem:[#allocation1 + $0x38] sm:$0xff] %vm83_vm0, %v178_v45 }
  0x22   :  { %188 = vst [vmem:[#allocation1 + $0x40] sm:$0xff] %v187_v47  ;;  %v264_v56 = vld [vmem:[#allocation1 + $0x20] sm:$0xff] }
  0x23   :  { %196 = vst.msk [vmem:[#allocation1 + $0x40] sm:$0xff] %vm83_vm0, %v192_v49 }
  0x24   :  { %201 = vst [vmem:[#allocation1 + $0x48] sm:$0xff] %v200_v50  ;;  %v266_v57 = vld [vmem:[#allocation1 + $0x28] sm:$0xff] }
  0x25   :  { %209 = vst.msk [vmem:[#allocation1 + $0x48] sm:$0xff] %vm83_vm0, %v205_v51 }
  0x26   :  { %257 = vst [vmem:[%s400_s1] sm:$0xff] %v256_v52  ;;  %v268_v58 = vld [vmem:[#allocation1 + $0x30] sm:$0xff] }
  0x27   :  { %259 = vst [vmem:[%s400_s1 + $0x8] sm:$0xff] %v258_v53 }
  0x28   :  { %261 = vst [vmem:[%s400_s1 + $0x10] sm:$0xff] %v260_v54  ;;  %v270_v59 = vld [vmem:[#allocation1 + $0x38] sm:$0xff] }
  0x29   :  { %263 = vst [vmem:[%s400_s1 + $0x18] sm:$0xff] %v262_v55 }
  0x2a   :  { %265 = vst [vmem:[%s400_s1 + $0x20] sm:$0xff] %v264_v56  ;;  %v272_v60 = vld [vmem:[#allocation1 + $0x40] sm:$0xff] }
  0x2b   :  { %267 = vst [vmem:[%s400_s1 + $0x28] sm:$0xff] %v266_v57 }
  0x2c   :  { %269 = vst [vmem:[%s400_s1 + $0x30] sm:$0xff] %v268_v58  ;;  %v274_v61 = vld [vmem:[#allocation1 + $0x48] sm:$0xff] }
  0x2d   :  { %271 = vst [vmem:[%s400_s1 + $0x38] sm:$0xff] %v270_v59 }
  0x2e   :  { %273 = vst [vmem:[%s400_s1 + $0x40] sm:$0xff] %v272_v60 }
  0x2f   :  { %275 = vst [vmem:[%s400_s1 + $0x48] sm:$0xff] %v274_v61 }

// kernel: a_call__.2
= control target key start
LH: loop header
LB: loop body
LE: loop exit
PB: predicated region body
PF: predicated region fallthrough
CT: control target
= control target key end

     0   :  { %vm606_vm0 = vcmask 1045508   ;;  %vm604_vm1 = vcmask 1041408   ;;  %vm608_vm2 = vcmask 1043456   ;;  %vm618_vm3 = vcmask 1041409   ;;  %s1377_s1 = inlined_call_operand.vmem [shape: bf16[128,512], index: 1, kind: input, shape index: {}]   ;;  %s1378_s2 = inlined_call_operand.vmem [shape: bf16[128,512], index: 2, kind: input, shape index: {}]   ;;  %s1379_s0 = inlined_call_operand.vmem [shape: bf16[16,128], index: 0, kind: input, shape index: {}]   ;;  %s1380_s3 = inlined_call_operand.vmem [shape: f32[2,512], index: 3, kind: output, shape index: {}]  }
   0x1   :  { %v750_v0 = vld [vmem:[%s1377_s1 + $0xe0] sm:$0xf]  ;;  %v923_v1 = vld [vmem:[%s1377_s1 + $0xec] sm:$0xf0]  ;;  %v921_v2 = vld [vmem:[%s1377_s1 + $0xe4] sm:$0xf] }
   0x2   :  { %v751_v3 = vor.u32 %v923_v1, %v750_v0  ;;  %v752_v4 = vld [vmem:[%s1377_s1 + $0xf0] sm:$0xf0]  ;;  %v758_v5 = vld [vmem:[%s1377_s1 + $0xe8] sm:$0xf]  ;;  %v924_v6 = vld [vmem:[%s1377_s1 + $0xf4] sm:$0xf0] }
   0x3   :  { %v755_v7 = vor.u32 %v921_v2, %v752_v4  ;;  %v759_v8 = vor.u32 %v924_v6, %v758_v5  ;;  %v922_v9 = vld [vmem:[%s1377_s1 + $0xec] sm:$0xf]  ;;  %v760_v10 = vld [vmem:[%s1377_s1 + $0xf8] sm:$0xf0]  ;;  %v734_v11 = vld [vmem:[%s1377_s1 + $0xc0] sm:$0xf] }
   0x4   :  { %214 = vmatpush.bf16.msra.mxu0 %v751_v3  ;;  %v763_v12 = vor.u32 %v922_v9, %v760_v10  ;;  %v919_v13 = vld [vmem:[%s1377_s1 + $0xcc] sm:$0xf0]  ;;  %v917_v14 = vld [vmem:[%s1377_s1 + $0xc4] sm:$0xf]  ;;  %v736_v15 = vld [vmem:[%s1377_s1 + $0xd0] sm:$0xf0] }
   0x5   :  { %228 = vmatpush.bf16.msra.mxu1 %v755_v7  ;;  %242 = vmatpush.bf16.msra.mxu2 %v759_v8  ;;  %v735_v16 = vor.u32 %v919_v13, %v734_v11  ;;  %v739_v17 = vor.u32 %v917_v14, %v736_v15  ;;  %v742_v18 = vld [vmem:[%s1377_s1 + $0xc8] sm:$0xf]  ;;  %v920_v19 = vld [vmem:[%s1377_s1 + $0xd4] sm:$0xf0]  ;;  %v918_v20 = vld [vmem:[%s1377_s1 + $0xcc] sm:$0xf] }
   0x6   :  { %256 = vmatpush.bf16.msra.mxu3 %v763_v12  ;;  %v743_v21 = vor.u32 %v920_v19, %v742_v18  ;;  %v744_v22 = vld [vmem:[%s1377_s1 + $0xd8] sm:$0xf0]  ;;  %v718_v23 = vld [vmem:[%s1377_s1 + $0xa0] sm:$0xf]  ;;  %v915_v24 = vld [vmem:[%s1377_s1 + $0xac] sm:$0xf0] }
   0x7   :  { %v747_v25 = vor.u32 %v918_v20, %v744_v22  ;;  %v913_v26 = vld [vmem:[%s1377_s1 + $0xa4] sm:$0xf]  ;;  %v720_v27 = vld [vmem:[%s1377_s1 + $0xb0] sm:$0xf0]  ;;  %v726_v28 = vld [vmem:[%s1377_s1 + $0xa8] sm:$0xf]  ;;  %v719_v29 = vor.u32 %v915_v24, %v718_v23 }
   0x8   :  { %215 = vmatpush.bf16.msra.mxu0 %v735_v16  ;;  %v916_v30 = vld [vmem:[%s1377_s1 + $0xb4] sm:$0xf0]  ;;  %v914_v31 = vld [vmem:[%s1377_s1 + $0xac] sm:$0xf]  ;;  %v728_v32 = vld [vmem:[%s1377_s1 + $0xb8] sm:$0xf0]  ;;  %v723_v33 = vor.u32 %v913_v26, %v720_v27 }
   0x9   :  { %229 = vmatpush.bf16.msra.mxu1 %v739_v17  ;;  %243 = vmatpush.bf16.msra.mxu2 %v743_v21  ;;  %v727_v34 = vor.u32 %v916_v30, %v726_v28  ;;  %v702_v35 = vld [vmem:[%s1377_s1 + $0x80] sm:$0xf]  ;;  %v911_v36 = vld [vmem:[%s1377_s1 + $0x8c] sm:$0xf0]  ;;  %v909_v37 = vld [vmem:[%s1377_s1 + $0x84] sm:$0xf]  ;;  %v731_v38 = vor.u32 %v914_v31, %v728_v32 }
   0xa   :  { %257 = vmatpush.bf16.msra.mxu3 %v747_v25  ;;  %v704_v39 = vld [vmem:[%s1377_s1 + $0x90] sm:$0xf0]  ;;  %v710_v40 = vld [vmem:[%s1377_s1 + $0x88] sm:$0xf]  ;;  %v912_v41 = vld [vmem:[%s1377_s1 + $0x94] sm:$0xf0]  ;;  %v703_v44 = vor.u32 %v911_v36, %v702_v35 }
   0xb   :  { %v910_v42 = vld [vmem:[%s1377_s1 + $0x8c] sm:$0xf]  ;;  %v712_v43 = vld [vmem:[%s1377_s1 + $0x98] sm:$0xf0]  ;;  %v707_v45 = vor.u32 %v909_v37, %v704_v39  ;;  %v711_v46 = vor.u32 %v912_v41, %v710_v40  ;;  %v686_v47 = vld [vmem:[%s1377_s1 + $0x60] sm:$0xf] }
   0xc   :  { %216 = vmatpush.bf16.msra.mxu0 %v719_v29  ;;  %v907_v48 = vld [vmem:[%s1377_s1 + $0x6c] sm:$0xf0]  ;;  %v905_v49 = vld [vmem:[%s1377_s1 + $0x64] sm:$0xf]  ;;  %v715_v50 = vor.u32 %v910_v42, %v712_v43  ;;  %v688_v51 = vld [vmem:[%s1377_s1 + $0x70] sm:$0xf0] }
   0xd   :  { %230 = vmatpush.bf16.msra.mxu1 %v723_v33  ;;  %244 = vmatpush.bf16.msra.mxu2 %v727_v34  ;;  %v694_v52 = vld [vmem:[%s1377_s1 + $0x68] sm:$0xf]  ;;  %v908_v53 = vld [vmem:[%s1377_s1 + $0x74] sm:$0xf0]  ;;  %v906_v54 = vld [vmem:[%s1377_s1 + $0x6c] sm:$0xf]  ;;  %v687_v56 = vor.u32 %v907_v48, %v686_v47  ;;  %v691_v57 = vor.u32 %v905_v49, %v688_v51 }
   0xe   :  { %258 = vmatpush.bf16.msra.mxu3 %v731_v38  ;;  %v696_v55 = vld [vmem:[%s1377_s1 + $0x78] sm:$0xf0]  ;;  %v695_v58 = vor.u32 %v908_v53, %v694_v52  ;;  %v670_v59 = vld [vmem:[%s1377_s1 + $0x40] sm:$0xf]  ;;  %v903_v60 = vld [vmem:[%s1377_s1 + $0x4c] sm:$0xf0] }
   0xf   :  { %v901_v61 = vld [vmem:[%s1377_s1 + $0x44] sm:$0xf]  ;;  %v699_v62 = vor.u32 %v906_v54, %v696_v55  ;;  %v672_v63 = vld [vmem:[%s1377_s1 + $0x50] sm:$0xf0]  ;;  %v678_v0 = vld [vmem:[%s1377_s1 + $0x48] sm:$0xf]  ;;  %v671_v4 = vor.u32 %v903_v60, %v670_v59 }
  0x10   :  { %217 = vmatpush.bf16.msra.mxu0 %v703_v44  ;;  %v904_v1 = vld [vmem:[%s1377_s1 + $0x54] sm:$0xf0]  ;;  %v902_v2 = vld [vmem:[%s1377_s1 + $0x4c] sm:$0xf]  ;;  %v680_v3 = vld [vmem:[%s1377_s1 + $0x58] sm:$0xf0]  ;;  %v675_v5 = vor.u32 %v901_v61, %v672_v63 }
  0x11   :  { %231 = vmatpush.bf16.msra.mxu1 %v707_v45  ;;  %245 = vmatpush.bf16.msra.mxu2 %v711_v46  ;;  %v679_v6 = vor.u32 %v904_v1, %v678_v0  ;;  %v654_v7 = vld [vmem:[%s1377_s1 + $0x20] sm:$0xf]  ;;  %v899_v8 = vld [vmem:[%s1377_s1 + $0x2c] sm:$0xf0]  ;;  %v897_v9 = vld [vmem:[%s1377_s1 + $0x24] sm:$0xf]  ;;  %v683_v10 = vor.u32 %v902_v2, %v680_v3 }
  0x12   :  { %259 = vmatpush.bf16.msra.mxu3 %v715_v50  ;;  %v656_v11 = vld [vmem:[%s1377_s1 + $0x30] sm:$0xf0]  ;;  %v662_v12 = vld [vmem:[%s1377_s1 + $0x28] sm:$0xf]  ;;  %v900_v13 = vld [vmem:[%s1377_s1 + $0x34] sm:$0xf0]  ;;  %v655_v16 = vor.u32 %v899_v8, %v654_v7 }
  0x13   :  { %v898_v14 = vld [vmem:[%s1377_s1 + $0x2c] sm:$0xf]  ;;  %v664_v15 = vld [vmem:[%s1377_s1 + $0x38] sm:$0xf0]  ;;  %v638_v17 = vld [vmem:[%s1377_s1] sm:$0xf]  ;;  %v659_v19 = vor.u32 %v897_v9, %v656_v11  ;;  %v663_v20 = vor.u32 %v900_v13, %v662_v12 }
  0x14   :  { %218 = vmatpush.bf16.msra.mxu0 %v687_v56  ;;  %v895_v18 = vld [vmem:[%s1377_s1 + $0xc] sm:$0xf0]  ;;  %v893_v21 = vld [vmem:[%s1377_s1 + $0x4] sm:$0xf]  ;;  %v640_v22 = vld [vmem:[%s1377_s1 + $0x10] sm:$0xf0]  ;;  %v667_v24 = vor.u32 %v898_v14, %v664_v15 }
  0x15   :  { %232 = vmatpush.bf16.msra.mxu1 %v691_v57  ;;  %246 = vmatpush.bf16.msra.mxu2 %v695_v58  ;;  %v646_v23 = vld [vmem:[%s1377_s1 + $0x8] sm:$0xf]  ;;  %v896_v25 = vld [vmem:[%s1377_s1 + $0x14] sm:$0xf0]  ;;  %v894_v26 = vld [vmem:[%s1377_s1 + $0xc] sm:$0xf]  ;;  %v639_v31 = vor.u32 %v895_v18, %v638_v17  ;;  %v643_v35 = vor.u32 %v893_v21, %v640_v22 }
  0x16   :  { %260 = vmatpush.bf16.msra.mxu3 %v699_v62  ;;  %v648_v27 = vld [vmem:[%s1377_s1 + $0x18] sm:$0xf0]  ;;  %v878_v28 = vld [vmem:[%s1378_s2 + $0xe0] sm:$0xf]  ;;  %v955_v29 = vld [vmem:[%s1378_s2 + $0xec] sm:$0xf0]  ;;  %v647_v36 = vor.u32 %v896_v25, %v646_v23 }
  0x17   :  { %v953_v30 = vld [vmem:[%s1378_s2 + $0xe4] sm:$0xf]  ;;  %v880_v32 = vld [vmem:[%s1378_s2 + $0xf0] sm:$0xf0]  ;;  %v886_v33 = vld [vmem:[%s1378_s2 + $0xe8] sm:$0xf]  ;;  %v651_v39 = vor.u32 %v894_v26, %v648_v27  ;;  %v879_v40 = vor.u32 %v955_v29, %v878_v28 }
  0x18   :  { %219 = vmatpush.bf16.msra.mxu0 %v671_v4  ;;  %v956_v34 = vld [vmem:[%s1378_s2 + $0xf4] sm:$0xf0]  ;;  %v954_v37 = vld [vmem:[%s1378_s2 + $0xec] sm:$0xf]  ;;  %v888_v38 = vld [vmem:[%s1378_s2 + $0xf8] sm:$0xf0]  ;;  %v883_v42 = vor.u32 %v953_v30, %v880_v32 }
  0x19   :  { %233 = vmatpush.bf16.msra.mxu1 %v675_v5  ;;  %247 = vmatpush.bf16.msra.mxu2 %v679_v6  ;;  %v862_v41 = vld [vmem:[%s1378_s2 + $0xc0] sm:$0xf]  ;;  %v887_v43 = vor.u32 %v956_v34, %v886_v33  ;;  %v951_v44 = vld [vmem:[%s1378_s2 + $0xcc] sm:$0xf0]  ;;  %v949_v45 = vld [vmem:[%s1378_s2 + $0xc4] sm:$0xf]  ;;  %v891_v47 = vor.u32 %v954_v37, %v888_v38 }
  0x1a   :  { %261 = vmatpush.bf16.msra.mxu3 %v683_v10  ;;  %v864_v46 = vld [vmem:[%s1378_s2 + $0xd0] sm:$0xf0]  ;;  %v870_v48 = vld [vmem:[%s1378_s2 + $0xc8] sm:$0xf]  ;;  %v952_v49 = vld [vmem:[%s1378_s2 + $0xd4] sm:$0xf0]  ;;  %v863_v53 = vor.u32 %v951_v44, %v862_v41 }
  0x1b   :  { %v1214_v50 = vld [vmem:[%s1379_s0] sm:$0xff]  ;;  %v950_v51 = vld [vmem:[%s1378_s2 + $0xcc] sm:$0xf]  ;;  %v872_v52 = vld [vmem:[%s1378_s2 + $0xd8] sm:$0xf0]  ;;  %v867_v54 = vor.u32 %v949_v45, %v864_v46  ;;  %v871_v55 = vor.u32 %v952_v49, %v870_v48  ;;  %vm620_vm4 = vcmask 1043459  }
  0x1c   :  { %220 = vmatpush.bf16.msra.mxu0 %v655_v16  ;;  %v846_v56 = vld [vmem:[%s1378_s2 + $0xa0] sm:$0xf]  ;;  %v947_v57 = vld [vmem:[%s1378_s2 + $0xac] sm:$0xf0]  ;;  %v945_v58 = vld [vmem:[%s1378_s2 + $0xa4] sm:$0xf]  ;;  %v875_v59 = vor.u32 %v950_v51, %v872_v52 }
  0x1d   :  { %234 = vmatpush.bf16.msra.mxu1 %v659_v19  ;;  %248 = vmatpush.bf16.msra.mxu2 %v663_v20  ;;  %v848_v60 = vld [vmem:[%s1378_s2 + $0xb0] sm:$0xf0]  ;;  %v854_v61 = vld [vmem:[%s1378_s2 + $0xa8] sm:$0xf]  ;;  %v948_v62 = vld [vmem:[%s1378_s2 + $0xb4] sm:$0xf0]  ;;  %v847_v1 = vor.u32 %v947_v57, %v846_v56 }
  0x1e   :  { %262 = vmatpush.bf16.msra.mxu3 %v667_v24  ;;  %v946_v63 = vld [vmem:[%s1378_s2 + $0xac] sm:$0xf]  ;;  %v856_v0 = vld [vmem:[%s1378_s2 + $0xb8] sm:$0xf0]  ;;  %v851_v2 = vor.u32 %v945_v58, %v848_v60  ;;  %v855_v3 = vor.u32 %v948_v62, %v854_v61  ;;  %v830_v4 = vld [vmem:[%s1378_s2 + $0x80] sm:$0xf] }
  0x1f   :  { %v943_v5 = vld [vmem:[%s1378_s2 + $0x8c] sm:$0xf0]  ;;  %v941_v6 = vld [vmem:[%s1378_s2 + $0x84] sm:$0xf]  ;;  %v859_v7 = vor.u32 %v946_v63, %v856_v0  ;;  %v832_v8 = vld [vmem:[%s1378_s2 + $0x90] sm:$0xf0] }
  0x20   :  { %221 = vmatpush.bf16.msra.mxu0 %v639_v31  ;;  %v838_v9 = vld [vmem:[%s1378_s2 + $0x88] sm:$0xf]  ;;  %v944_v10 = vld [vmem:[%s1378_s2 + $0x94] sm:$0xf0]  ;;  %v942_v11 = vld [vmem:[%s1378_s2 + $0x8c] sm:$0xf]  ;;  %v831_v13 = vor.u32 %v943_v5, %v830_v4  ;;  %v835_v14 = vor.u32 %v941_v6, %v832_v8 }
  0x21   :  { %235 = vmatpush.bf16.msra.mxu1 %v643_v35  ;;  %249 = vmatpush.bf16.msra.mxu2 %v647_v36  ;;  %v840_v12 = vld [vmem:[%s1378_s2 + $0x98] sm:$0xf0]  ;;  %v839_v15 = vor.u32 %v944_v10, %v838_v9  ;;  %v814_v16 = vld [vmem:[%s1378_s2 + $0x60] sm:$0xf]  ;;  %v939_v17 = vld [vmem:[%s1378_s2 + $0x6c] sm:$0xf0] }
  0x22   :  { %263 = vmatpush.bf16.msra.mxu3 %v651_v39  ;;  %v937_v18 = vld [vmem:[%s1378_s2 + $0x64] sm:$0xf]  ;;  %v843_v19 = vor.u32 %v942_v11, %v840_v12  ;;  %v816_v20 = vld [vmem:[%s1378_s2 + $0x70] sm:$0xf0]  ;;  %v822_v21 = vld [vmem:[%s1378_s2 + $0x68] sm:$0xf]  ;;  %v815_v25 = vor.u32 %v939_v17, %v814_v16 }
  0x23   :  { %222 = vmatmul.bf16.vlgmr.msra.gmra.mxu0 %v1214_v50  ;;  %v940_v22 = vld [vmem:[%s1378_s2 + $0x74] sm:$0xf0]  ;;  %v938_v23 = vld [vmem:[%s1378_s2 + $0x6c] sm:$0xf]  ;;  %v824_v24 = vld [vmem:[%s1378_s2 + $0x78] sm:$0xf0]  ;;  %v819_v26 = vor.u32 %v937_v18, %v816_v20 }
  0x24   :  { %462 = vmatpush.bf16.msrb.mxu0 %v879_v40  ;;  %250 = vmatmul.bf16.vlgmr.msra.gmra.mxu2 %v1214_v50  ;;  %v823_v27 = vor.u32 %v940_v22, %v822_v21  ;;  %v798_v28 = vld [vmem:[%s1378_s2 + $0x40] sm:$0xf]  ;;  %v935_v29 = vld [vmem:[%s1378_s2 + $0x4c] sm:$0xf0]  ;;  %v933_v30 = vld [vmem:[%s1378_s2 + $0x44] sm:$0xf]  ;;  %v827_v31 = vor.u32 %v938_v23, %v824_v24 }
  0x25   :  { %476 = vmatpush.bf16.msrb.mxu1 %v883_v42  ;;  %490 = vmatpush.bf16.msrb.mxu2 %v887_v43  ;;  %v800_v32 = vld [vmem:[%s1378_s2 + $0x50] sm:$0xf0]  ;;  %v806_v33 = vld [vmem:[%s1378_s2 + $0x48] sm:$0xf]  ;;  %v936_v34 = vld [vmem:[%s1378_s2 + $0x54] sm:$0xf0]  ;;  %v799_v37 = vor.u32 %v935_v29, %v798_v28 }
  0x26   :  { %504 = vmatpush.bf16.msrb.mxu3 %v891_v47  ;;  %236 = vmatmul.bf16.vlgmr.msra.gmra.mxu1 %v1214_v50  ;;  %v934_v35 = vld [vmem:[%s1378_s2 + $0x4c] sm:$0xf]  ;;  %v808_v36 = vld [vmem:[%s1378_s2 + $0x58] sm:$0xf0]  ;;  %v803_v38 = vor.u32 %v933_v30, %v800_v32  ;;  %v807_v39 = vor.u32 %v936_v34, %v806_v33  ;;  %v782_v40 = vld [vmem:[%s1378_s2 + $0x20] sm:$0xf] }
  0x27   :  { %264 = vmatmul.bf16.vlgmr.msra.gmra.mxu3 %v1214_v50  ;;  %v931_v41 = vld [vmem:[%s1378_s2 + $0x2c] sm:$0xf0]  ;;  %v929_v42 = vld [vmem:[%s1378_s2 + $0x24] sm:$0xf]  ;;  %v811_v43 = vor.u32 %v934_v35, %v808_v36  ;;  %v784_v44 = vld [vmem:[%s1378_s2 + $0x30] sm:$0xf0] }
  0x28   :  { %463 = vmatpush.bf16.msrb.mxu0 %v863_v53  ;;  %v790_v45 = vld [vmem:[%s1378_s2 + $0x28] sm:$0xf]  ;;  %v932_v46 = vld [vmem:[%s1378_s2 + $0x34] sm:$0xf0]  ;;  %v930_v47 = vld [vmem:[%s1378_s2 + $0x2c] sm:$0xf]  ;;  %v783_v49 = vor.u32 %v931_v41, %v782_v40  ;;  %v787_v51 = vor.u32 %v929_v42, %v784_v44 }
  0x29   :  { %477 = vmatpush.bf16.msrb.mxu1 %v867_v54  ;;  %491 = vmatpush.bf16.msrb.mxu2 %v871_v55  ;;  %v792_v48 = vld [vmem:[%s1378_s2 + $0x38] sm:$0xf0]  ;;  %v791_v52 = vor.u32 %v932_v46, %v790_v45  ;;  %v766_v53 = vld [vmem:[%s1378_s2] sm:$0xf]  ;;  %v927_v54 = vld [vmem:[%s1378_s2 + $0xc] sm:$0xf0] }
  0x2a   :  { %505 = vmatpush.bf16.msrb.mxu3 %v875_v59  ;;  %v925_v55 = vld [vmem:[%s1378_s2 + $0x4] sm:$0xf]  ;;  %v795_v56 = vor.u32 %v930_v47, %v792_v48  ;;  %v768_v57 = vld [vmem:[%s1378_s2 + $0x10] sm:$0xf0]  ;;  %v774_v58 = vld [vmem:[%s1378_s2 + $0x8] sm:$0xf]  ;;  %v767_v62 = vor.u32 %v927_v54, %v766_v53 }
  0x2b   :  { %v928_v59 = vld [vmem:[%s1378_s2 + $0x14] sm:$0xf0]  ;;  %v926_v60 = vld [vmem:[%s1378_s2 + $0xc] sm:$0xf]  ;;  %v776_v61 = vld [vmem:[%s1378_s2 + $0x18] sm:$0xf0]  ;;  %v771_v63 = vor.u32 %v925_v55, %v768_v57 }
  0x2c   :  { %464 = vmatpush.bf16.msrb.mxu0 %v847_v1  ;;  %v775_v0 = vor.u32 %v928_v59, %v774_v58  ;;  %v779_v1 = vor.u32 %v926_v60, %v776_v61  ;;  %vm622_vm5 = vcmask 1045509   ;;  %vm624_vm6 = vcmask 1047559  }
  0x2d   :  { %478 = vmatpush.bf16.msrb.mxu1 %v851_v2  ;;  %492 = vmatpush.bf16.msrb.mxu2 %v855_v3 }
  0x2e   :  { %506 = vmatpush.bf16.msrb.mxu3 %v859_v7 }
  0x30   :  { %465 = vmatpush.bf16.msrb.mxu0 %v831_v13 }
  0x31   :  { %479 = vmatpush.bf16.msrb.mxu1 %v835_v14  ;;  %493 = vmatpush.bf16.msrb.mxu2 %v839_v15 }
  0x32   :  { %507 = vmatpush.bf16.msrb.mxu3 %v843_v19 }
  0x34   :  { %466 = vmatpush.bf16.msrb.mxu0 %v815_v25 }
  0x35   :  { %480 = vmatpush.bf16.msrb.mxu1 %v819_v26  ;;  %494 = vmatpush.bf16.msrb.mxu2 %v823_v27 }
  0x36   :  { %508 = vmatpush.bf16.msrb.mxu3 %v827_v31 }
  0x38   :  { %467 = vmatpush.bf16.msrb.mxu0 %v799_v37 }
  0x39   :  { %481 = vmatpush.bf16.msrb.mxu1 %v803_v38  ;;  %495 = vmatpush.bf16.msrb.mxu2 %v807_v39 }
  0x3a   :  { %509 = vmatpush.bf16.msrb.mxu3 %v811_v43 }
  0x3c   :  { %468 = vmatpush.bf16.msrb.mxu0 %v783_v49 }
  0x3d   :  { %482 = vmatpush.bf16.msrb.mxu1 %v787_v51  ;;  %496 = vmatpush.bf16.msrb.mxu2 %v791_v52 }
  0x3e   :  { %510 = vmatpush.bf16.msrb.mxu3 %v795_v56 }
  0x40   :  { %469 = vmatpush.bf16.msrb.mxu0 %v767_v62 }
  0x41   :  { %483 = vmatpush.bf16.msrb.mxu1 %v771_v63  ;;  %497 = vmatpush.bf16.msrb.mxu2 %v775_v0 }
  0x42   :  { %511 = vmatpush.bf16.msrb.mxu3 %v779_v1 }
  0x43   :  { %470 = vmatmul.bf16.vlgmr.msrb.gmra.mxu0 %v1214_v50 }
  0x44   :  { %484 = vmatmul.bf16.vlgmr.msrb.gmra.mxu1 %v1214_v50  ;;  %498 = vmatmul.bf16.vlgmr.msrb.gmra.mxu2 %v1214_v50 }
  0x45   :  { %512 = vmatmul.bf16.vlgmr.msrb.gmra.mxu3 %v1214_v50 }
  0xa0   :  { %v223_v2 = vpop.f32.mrf.mxu0 }
  0xa1   :  { %v518_v19 = vmul.f32 %v223_v2, %v223_v2 }
  0xa3   :  { %v237_v3 = vpop.f32.mrf.mxu1 }
  0xa4   :  { %v519_v13 = vmul.f32 %v237_v3, %v237_v3 }
  0xa7   :  { %v251_v4 = vpop.f32.mrf.mxu2 }
  0xa8   :  { %v225_v6 = vpop.f32.mrf.mxu0  ;;  %v520_v17 = vmul.f32 %v251_v4, %v251_v4 }
  0xa9   :  { %v522_v22 = vmul.f32 %v225_v6, %v225_v6 }
  0xaa   :  { %v265_v5 = vpop.f32.mrf.mxu3 }
  0xab   :  { %v239_v7 = vpop.f32.mrf.mxu1  ;;  %v521_v18 = vmul.f32 %v265_v5, %v265_v5 }
  0xac   :  { %v523_v27 = vmul.f32 %v239_v7, %v239_v7 }
  0xaf   :  { %v253_v8 = vpop.f32.mrf.mxu2 }
  0xb0   :  { %v524_v41 = vmul.f32 %v253_v8, %v253_v8 }
  0xb2   :  { %v267_v9 = vpop.f32.mrf.mxu3 }
  0xb3   :  { %v525_v44 = vmul.f32 %v267_v9, %v267_v9 }
  0xc0   :  { %v471_v10 = vpop.f32.mrf.mxu0 }
  0xc1   :  { %v485_v11 = vpop.f32.mrf.mxu1  ;;  %v526_v15 = vmul.f32 %v471_v10, %v471_v10 }
  0xc2   :  { %v527_v12 = vmul.f32 %v485_v11, %v485_v11 }
  0xc3   :  { %v534_v28 = vadd.f32 %v526_v15, %v518_v19 }
  0xc4   :  { %v535_v14 = vadd.f32 %v527_v12, %v519_v13 }
  0xc5   :  { %v542_v38 = vrot.slane %v534_v28, 4 }
  0xc6   :  { %v548_v23 = vrot.slane %v535_v14, 4 }
  0xc7   :  { %v499_v16 = vpop.f32.mrf.mxu2  ;;  %v543_v54 = vadd.f32 %v542_v38, %v534_v28 }
  0xc8   :  { %v528_v20 = vmul.f32 %v499_v16, %v499_v16  ;;  %v513_v50 = vpop.f32.mrf.mxu3  ;;  %v473_v21 = vpop.f32.mrf.mxu0  ;;  %v549_v35 = vadd.f32 %v548_v23, %v535_v14 }
  0xc9   :  { %v529_v24 = vmul.f32 %v513_v50, %v513_v50  ;;  %v530_v25 = vmul.f32 %v473_v21, %v473_v21  ;;  %v487_v26 = vpop.f32.mrf.mxu1  ;;  %v544_v1 = vrot.slane %v543_v54, 2 }
  0xca   :  { %v536_v29 = vadd.f32 %v528_v20, %v520_v17  ;;  %v531_v30 = vmul.f32 %v487_v26, %v487_v26  ;;  %v550_v49 = vrot.slane %v549_v35, 2 }
  0xcb   :  { %v537_v31 = vadd.f32 %v529_v24, %v521_v18  ;;  %v538_v32 = vadd.f32 %v530_v25, %v522_v22  ;;  %v545_v11 = vadd.f32 %v544_v1, %v543_v54 }
  0xcc   :  { %v554_v33 = vrot.slane %v536_v29, 4  ;;  %v539_v34 = vadd.f32 %v531_v30, %v523_v27  ;;  %v551_v62 = vadd.f32 %v550_v49, %v549_v35 }
  0xcd   :  { %v560_v36 = vrot.slane %v537_v31, 4  ;;  %v566_v37 = vrot.slane %v538_v32, 4  ;;  %v546_v50 = vrot.slane %v545_v11, 1 }
  0xce   :  { %v555_v39 = vadd.f32 %v554_v33, %v536_v29  ;;  %v572_v40 = vrot.slane %v539_v34, 4  ;;  %v552_v8 = vrot.slane %v551_v62, 1 }
  0xcf   :  { %v561_v42 = vadd.f32 %v560_v36, %v537_v31  ;;  %v501_v43 = vpop.f32.mrf.mxu2  ;;  %v567_v52 = vadd.f32 %v566_v37, %v538_v32  ;;  %v547_v30 = vadd.f32 %v546_v50, %v545_v11 }
  0xd0   :  { %v556_v45 = vrot.slane %v555_v39, 2  ;;  %v573_v46 = vadd.f32 %v572_v40, %v539_v34  ;;  %v532_v47 = vmul.f32 %v501_v43, %v501_v43  ;;  %v515_v48 = vpop.f32.mrf.mxu3  ;;  %v553_v18 = vadd.f32 %v552_v8, %v551_v62 }
  0xd1   :  { %v562_v51 = vrot.slane %v561_v42, 2  ;;  %v533_v53 = vmul.f32 %v515_v48, %v515_v48  ;;  %v568_v63 = vrot.slane %v567_v52, 2 }
  0xd2   :  { %v574_v55 = vrot.slane %v573_v46, 2  ;;  %v540_v56 = vadd.f32 %v532_v47, %v524_v41  ;;  %v557_v57 = vadd.f32 %v556_v45, %v555_v39  ;;  %v598_v27 = vrot.slane %v553_v18, 6 }
  0xd3   :  { %v563_v58 = vadd.f32 %v562_v51, %v561_v42  ;;  %v541_v59 = vadd.f32 %v533_v53, %v525_v44  ;;  %v569_v9 = vadd.f32 %v568_v63, %v567_v52 }
  0xd4   :  { %v575_v60 = vadd.f32 %v574_v55, %v573_v46  ;;  %v578_v61 = vrot.slane %v540_v56, 4  ;;  %v558_v3 = vrot.slane %v557_v57, 1  ;;  %v605_v35 = vsel %vm604_vm1, %v547_v30, %v598_v27 }
  0xd5   :  { %v584_v0 = vrot.slane %v541_v59, 4  ;;  %v564_v4 = vrot.slane %v563_v58, 1  ;;  %v570_v19 = vrot.slane %v569_v9, 1 }
  0xd6   :  { %v579_v2 = vadd.f32 %v578_v61, %v540_v56  ;;  %v576_v5 = vrot.slane %v575_v60, 1  ;;  %v559_v13 = vadd.f32 %v558_v3, %v557_v57 }
  0xd7   :  { %v585_v6 = vadd.f32 %v584_v0, %v541_v59  ;;  %v565_v14 = vadd.f32 %v564_v4, %v563_v58  ;;  %v571_v28 = vadd.f32 %v570_v19, %v569_v9 }
  0xd8   :  { %v580_v7 = vrot.slane %v579_v2, 2  ;;  %v577_v15 = vadd.f32 %v576_v5, %v575_v60  ;;  %v599_v22 = vrot.slane %v559_v13, 4 }
  0xd9   :  { %v586_v10 = vrot.slane %v585_v6, 2  ;;  %v600_v23 = vrot.slane %v565_v14, 2 }
  0xda   :  { %v581_v12 = vadd.f32 %v580_v7, %v579_v2  ;;  %v601_v24 = vrot.slane %v577_v15, 6 }
  0xdb   :  { %v587_v16 = vadd.f32 %v586_v10, %v585_v6  ;;  %v607_v31 = vsel %vm606_vm0, %v599_v22, %v600_v23 }
  0xdc   :  { %v582_v17 = vrot.slane %v581_v12, 1  ;;  %v610_v32 = vsel %vm604_vm1, %v571_v28, %v601_v24  ;;  %v609_v37 = vsel %vm608_vm2, %v605_v35, %v607_v31 }
  0xdd   :  { %v588_v20 = vrot.slane %v587_v16, 1 }
  0xde   :  { %v583_v21 = vadd.f32 %v582_v17, %v581_v12 }
  0xdf   :  { %v589_v25 = vadd.f32 %v588_v20, %v587_v16 }
  0xe0   :  { %v602_v26 = vrot.slane %v583_v21, 4 }
  0xe1   :  { %v603_v29 = vrot.slane %v589_v25, 2 }
  0xe3   :  { %v611_v33 = vsel %vm606_vm0, %v602_v26, %v603_v29 }
  0xe4   :  { %v612_v34 = vsel %vm608_vm2, %v610_v32, %v611_v33 }
  0xe5   :  { %v617_v36 = vrot.slane %v612_v34, 7 }
  0xe7   :  { %v619_v38 = vsel %vm618_vm3, %v617_v36, %v609_v37 }
  0xe8   :  { %v621_v39 = vsel %vm620_vm4, %v617_v36, %v619_v38 }
  0xe9   :  { %v623_v40 = vsel %vm622_vm5, %v617_v36, %v621_v39 }
  0xea   :  { %v625_v41 = vsel %vm624_vm6, %v617_v36, %v623_v40 }
  0xeb   :  { %627 = vst [vmem:[%s1380_s3] sm:$0xff] %v625_v41 }

// kernel: a_call__.3
= control target key start
LH: loop header
LB: loop body
LE: loop exit
PB: predicated region body
PF: predicated region fallthrough
CT: control target
= control target key end

     0   :  { %s1208_s12 = smov 0   ;;  %s1210_s13 = smov 0   ;;  %s1498_s0 = inlined_call_operand.vmem [shape: bf16[8,256], index: 0, kind: input, shape index: {}]   ;;  %s1499_s1 = inlined_call_operand.vmem [shape: bf16[256,256], index: 1, kind: input, shape index: {}]   ;;  %s1500_s2 = inlined_call_operand.vmem [shape: f32[8,256], index: 2, kind: input, shape index: {}]   ;;  %s1501_s3 = inlined_call_operand.vmem [shape: f32[2,8,256], index: 3, kind: output, shape index: {}]  }
   0x1   :  { %s1212_s14 = smov 0   ;;  %s1214_s15 = smov 0  }
   0x2   :  { %s1216_s16 = smov 0  }
   0x3 LB: > { %s25_s17 = sadd.s32 1, %s1181_s15  ;;  %p62_p1 = scmp.ne.s32.totalorder %s1173_s13, %s1169_s12  ;;  %s1185_s16 = sphi %s1216_s16, %s13_s16   ;;  %s1181_s15 = sphi %s1214_s15, %s1505_s15   ;;  %s1177_s14 = sphi %s1212_s14, %s1504_s14   ;;  %s1173_s13 = sphi %s1210_s13, %s1503_s13   ;;  %s1169_s12 = sphi %s1208_s12, %s1502_s12  }
   0x4   : > { %p27_p0 = scmp.ge.s32.totalorder %s25_s17, 2  ;;  %p63_p2 = scmp.eq.s32.totalorder %s1185_s16, 0 }
   0x5   : > { %s55_s19 = sadd.s32 1, %s1173_s13  ;;  %p991_p5 = scmp.ge.s32.totalorder %s1185_s16, 2 }
   0x6   : > { %s1507_s17 = smov (%p27_p0, %s25_s17), 0  ;;  %p64_p3 = por %p63_p2, %p62_p1 }
   0x7   : > { %s52_s18 = ssub.s32 %s1181_s15, %s1507_s17  ;;  %145 = sbr.rel (%p991_p5) target bundleno = 48 (0x30), region = 20 }
   0x8   : > { %p53_p4 = scmp.eq.s32.totalorder %s52_s18, 0 }
   0xa   : > { %s1243_s20 = scalar_select %p53_p4, %s1173_s13, %s55_s19  }
   0xc   : > { %148 = sbr.rel (!%p64_p3) target bundleno = 48 (0x30), region = 24  ;;  %s150_s21 = sand.u32 (%p64_p3), 1, %s1173_s13  }
   0xd   : > { %s993_s22 = sshll.u32 (%p64_p3), %s1181_s15, 2  ;;  %s992_s23 = sshll.u32 (%p64_p3), %s150_s21, 7 }
   0xe   : > { %s1251_s26 = scalar_lea.vmem (%p64_p3), %s1499_s1, %s993_s22  ;;  %s1255_s27 = scalar_lea.vmem (%p64_p3), [#allocation3], %s992_s23 }
   0xf   : > { %v172_v0 = vld [vmem:[%s1251_s26] sm:$0xf] (%p64_p3)  ;;  %v174_v1 = vld [vmem:[%s1251_s26 + $0x8] sm:$0xf] (%p64_p3)  ;;  %v176_v2 = vld [vmem:[%s1251_s26 + $0x10] sm:$0xf] (%p64_p3) }
  0x10   : > { %173 = vst [vmem:[%s1255_s27] sm:$0xf] (%p64_p3), %v172_v0  ;;  %v178_v3 = vld [vmem:[%s1251_s26 + $0x18] sm:$0xf] (%p64_p3)  ;;  %v180_v4 = vld [vmem:[%s1251_s26 + $0x20] sm:$0xf] (%p64_p3) }
  0x11   : > { %175 = vst [vmem:[%s1255_s27 + $0x4] sm:$0xf] %v174_v1  ;;  %v182_v5 = vld [vmem:[%s1251_s26 + $0x28] sm:$0xf]  ;;  %v184_v6 = vld [vmem:[%s1251_s26 + $0x30] sm:$0xf] }
  0x12   : > { %177 = vst [vmem:[%s1255_s27 + $0x8] sm:$0xf] %v176_v2  ;;  %v186_v7 = vld [vmem:[%s1251_s26 + $0x38] sm:$0xf]  ;;  %v188_v8 = vld [vmem:[%s1251_s26 + $0x40] sm:$0xf] }
  0x13   : > { %179 = vst [vmem:[%s1255_s27 + $0xc] sm:$0xf] %v178_v3  ;;  %v190_v9 = vld [vmem:[%s1251_s26 + $0x48] sm:$0xf]  ;;  %v192_v10 = vld [vmem:[%s1251_s26 + $0x50] sm:$0xf] }
  0x14   : > { %181 = vst [vmem:[%s1255_s27 + $0x10] sm:$0xf] %v180_v4  ;;  %v194_v11 = vld [vmem:[%s1251_s26 + $0x58] sm:$0xf]  ;;  %v196_v12 = vld [vmem:[%s1251_s26 + $0x60] sm:$0xf] }
  0x15   : > { %183 = vst [vmem:[%s1255_s27 + $0x14] sm:$0xf] %v182_v5  ;;  %v198_v13 = vld [vmem:[%s1251_s26 + $0x68] sm:$0xf]  ;;  %v200_v14 = vld [vmem:[%s1251_s26 + $0x70] sm:$0xf] }
  0x16   : > { %185 = vst [vmem:[%s1255_s27 + $0x18] sm:$0xf] %v184_v6  ;;  %v202_v15 = vld [vmem:[%s1251_s26 + $0x78] sm:$0xf]  ;;  %v204_v16 = vld [vmem:[%s1251_s26 + $0x80] sm:$0xf] }
  0x17   : > { %187 = vst [vmem:[%s1255_s27 + $0x1c] sm:$0xf] %v186_v7  ;;  %v206_v17 = vld [vmem:[%s1251_s26 + $0x88] sm:$0xf]  ;;  %v208_v18 = vld [vmem:[%s1251_s26 + $0x90] sm:$0xf] }
  0x18   : > { %189 = vst [vmem:[%s1255_s27 + $0x20] sm:$0xf] %v188_v8  ;;  %v210_v19 = vld [vmem:[%s1251_s26 + $0x98] sm:$0xf]  ;;  %v212_v20 = vld [vmem:[%s1251_s26 + $0xa0] sm:$0xf] }
  0x19   : > { %191 = vst [vmem:[%s1255_s27 + $0x24] sm:$0xf] %v190_v9  ;;  %v214_v21 = vld [vmem:[%s1251_s26 + $0xa8] sm:$0xf]  ;;  %v216_v22 = vld [vmem:[%s1251_s26 + $0xb0] sm:$0xf] }
  0x1a   : > { %193 = vst [vmem:[%s1255_s27 + $0x28] sm:$0xf] %v192_v10  ;;  %v218_v23 = vld [vmem:[%s1251_s26 + $0xb8] sm:$0xf]  ;;  %v220_v24 = vld [vmem:[%s1251_s26 + $0xc0] sm:$0xf] }
  0x1b   : > { %195 = vst [vmem:[%s1255_s27 + $0x2c] sm:$0xf] %v194_v11  ;;  %v222_v25 = vld [vmem:[%s1251_s26 + $0xc8] sm:$0xf]  ;;  %v224_v26 = vld [vmem:[%s1251_s26 + $0xd0] sm:$0xf] }
  0x1c   : > { %197 = vst [vmem:[%s1255_s27 + $0x30] sm:$0xf] %v196_v12  ;;  %v226_v27 = vld [vmem:[%s1251_s26 + $0xd8] sm:$0xf]  ;;  %v228_v28 = vld [vmem:[%s1251_s26 + $0xe0] sm:$0xf] }
  0x1d   : > { %199 = vst [vmem:[%s1255_s27 + $0x34] sm:$0xf] %v198_v13  ;;  %v230_v29 = vld [vmem:[%s1251_s26 + $0xe8] sm:$0xf]  ;;  %v232_v30 = vld [vmem:[%s1251_s26 + $0xf0] sm:$0xf] }
  0x1e   : > { %201 = vst [vmem:[%s1255_s27 + $0x38] sm:$0xf] %v200_v14  ;;  %v234_v31 = vld [vmem:[%s1251_s26 + $0xf8] sm:$0xf] }
  0x1f   : > { %203 = vst [vmem:[%s1255_s27 + $0x3c] sm:$0xf] %v202_v15 }
  0x20   : > { %205 = vst [vmem:[%s1255_s27 + $0x40] sm:$0xf] %v204_v16 }
  0x21   : > { %207 = vst [vmem:[%s1255_s27 + $0x44] sm:$0xf] %v206_v17 }
  0x22   : > { %209 = vst [vmem:[%s1255_s27 + $0x48] sm:$0xf] %v208_v18 }
  0x23   : > { %211 = vst [vmem:[%s1255_s27 + $0x4c] sm:$0xf] %v210_v19 }
  0x24   : > { %213 = vst [vmem:[%s1255_s27 + $0x50] sm:$0xf] %v212_v20 }
  0x25   : > { %215 = vst [vmem:[%s1255_s27 + $0x54] sm:$0xf] %v214_v21 }
  0x26   : > { %217 = vst [vmem:[%s1255_s27 + $0x58] sm:$0xf] %v216_v22 }
  0x27   : > { %219 = vst [vmem:[%s1255_s27 + $0x5c] sm:$0xf] %v218_v23 }
  0x28   : > { %221 = vst [vmem:[%s1255_s27 + $0x60] sm:$0xf] %v220_v24 }
  0x29   : > { %223 = vst [vmem:[%s1255_s27 + $0x64] sm:$0xf] %v222_v25 }
  0x2a   : > { %225 = vst [vmem:[%s1255_s27 + $0x68] sm:$0xf] %v224_v26 }
  0x2b   : > { %227 = vst [vmem:[%s1255_s27 + $0x6c] sm:$0xf] %v226_v27 }
  0x2c   : > { %229 = vst [vmem:[%s1255_s27 + $0x70] sm:$0xf] %v228_v28 }
  0x2d   : > { %231 = vst [vmem:[%s1255_s27 + $0x74] sm:$0xf] %v230_v29 }
  0x2e   : > { %233 = vst [vmem:[%s1255_s27 + $0x78] sm:$0xf] %v232_v30 }
  0x2f   : > { %235 = vst [vmem:[%s1255_s27 + $0x7c] sm:$0xf] %v234_v31 }
  0x30 PF: > { %p994_p6 = scmp.ge.s32.totalorder %s1185_s16, 1  ;;  %p331_p7 = scmp.lt.s32.totalorder %s1185_s16, 3 }
  0x32   : > { %p332_p8 = pnand %p994_p6, %p331_p7 }
  0x33   : > { %s338_s28 = sand.u32 (!%p332_p8), 1, %s1169_s12   ;;  %p368_p9 = scmp.lt.s32.totalorder (!%p332_p8), %s1177_s14, 1 }
  0x34   : > { %335 = sbr.rel (%p332_p8) target bundleno = 879 (0x36f), region = 69  ;;  %s995_s29 = sshll.u32 (!%p332_p8), %s338_s28, 7 }
  0x35   : > { %s1322_s30 = scalar_lea.vmem (!%p332_p8), [#allocation3], %s995_s29 }
  0x39   : > { %v1325_v32 = vld [vmem:[%s1322_s30 + $0x38] sm:$0xff]  ;;  %v1333_v34 = vld [vmem:[%s1322_s30 + $0x30] sm:$0xff]  ;;  %v1341_v36 = vld [vmem:[%s1322_s30 + $0x28] sm:$0xff]  ;;  %s1509_s14 = smov (!%p368_p9, %s1177_s14), 1  ;;  %vm382_vm0 = vcmask 64512   ;;  %v1187_v20 = vmov 0.0  }
  0x3a   : > { %v1328_v33 = vld [vmem:[%s1322_s30 + $0x78] sm:$0xff]  ;;  %551 = vmatpush.bf16.msra.mxu0 %v1325_v32  ;;  %v1336_v35 = vld [vmem:[%s1322_s30 + $0x70] sm:$0xff]  ;;  %v1344_v37 = vld [vmem:[%s1322_s30 + $0x68] sm:$0xff]  ;;  %s996_s6 = sshll.u32 %s1509_s14, 3  ;;  %383 = vst.msk [vmem:[#allocation2] sm:$0xff] %vm382_vm0, %v1187_v20  ;;  %s1065_s10 = sshll.u32 %s1509_s14, 4 }
  0x3b   : > { %564 = vmatpush.bf16.msra.mxu1 %v1328_v33  ;;  %v1349_v38 = vld [vmem:[%s1322_s30 + $0x20] sm:$0xff]  ;;  %v1357_v40 = vld [vmem:[%s1322_s30 + $0x18] sm:$0xff]  ;;  %v1365_v42 = vld [vmem:[%s1322_s30 + $0x10] sm:$0xff]  ;;  %s371_s9 = scalar_lea.vmem %s1500_s2, %s996_s6  ;;  %384 = vst.msk [vmem:[#allocation2 + $0x8] sm:$0xff] %vm382_vm0, %v1187_v20  ;;  %s377_s18 = scalar_lea.vmem %s1501_s3, %s1065_s10 }
  0x3c   : > { %v1352_v39 = vld [vmem:[%s1322_s30 + $0x60] sm:$0xff]  ;;  %v1360_v41 = vld [vmem:[%s1322_s30 + $0x58] sm:$0xff]  ;;  %v1368_v43 = vld [vmem:[%s1322_s30 + $0x50] sm:$0xff]  ;;  %385 = vst.msk [vmem:[#allocation2 + $0x10] sm:$0xff] %vm382_vm0, %v1187_v20 }
  0x3d   : > { %v1373_v44 = vld [vmem:[%s1322_s30 + $0x8] sm:$0xff]  ;;  %v447_v46 = vld [vmem:[%s1498_s0] sm:$0xff]  ;;  %386 = vst.msk [vmem:[#allocation2 + $0x18] sm:$0xff] %vm382_vm0, %v1187_v20 }
  0x3e   : > { %552 = vmatpush.bf16.msra.mxu0 %v1333_v34  ;;  %v1376_v45 = vld [vmem:[%s1322_s30 + $0x48] sm:$0xff]  ;;  %v449_v47 = vunpack.c.l.b16 %v447_v46  ;;  %v450_v48 = vunpack.c.h.b16 %v447_v46  ;;  %v1384_v49 = vld [vmem:[%s1322_s30] sm:$0xff]  ;;  %387 = vst.msk [vmem:[#allocation2 + $0x20] sm:$0xff] %vm382_vm0, %v1187_v20 }
  0x3f   : > { %565 = vmatpush.bf16.msra.mxu1 %v1336_v35  ;;  %v1387_v50 = vld [vmem:[%s1322_s30 + $0x40] sm:$0xff]  ;;  %388 = vst.msk [vmem:[#allocation2 + $0x28] sm:$0xff] %vm382_vm0, %v1187_v20 }
  0x40   : > { %v451_v51 = vpack.c.b16 %v449_v47, %v449_v47  ;;  %v452_v52 = vpack.c.b16 %v450_v48, %v450_v48  ;;  %v577_v55 = vld [vmem:[%s371_s9] sm:$0xff]  ;;  %389 = vst.msk [vmem:[#allocation2 + $0x30] sm:$0xff] %vm382_vm0, %v1187_v20 }
  0x41   : > { %390 = vst.msk [vmem:[#allocation2 + $0x38] sm:$0xff] %vm382_vm0, %v1187_v20  ;;  %v619_v21 = vld [vmem:[#allocation2] sm:$0xff] }
  0x42   : > { %553 = vmatpush.bf16.msra.mxu0 %v1341_v36  ;;  %391 = vst.msk [vmem:[#allocation2 + $0x40] sm:$0xff] %vm382_vm0, %v1187_v20  ;;  %v620_v25 = vld [vmem:[#allocation2 + $0x8] sm:$0xff] }
  0x43   : > { %566 = vmatpush.bf16.msra.mxu1 %v1344_v37  ;;  %392 = vst.msk [vmem:[#allocation2 + $0x48] sm:$0xff] %vm382_vm0, %v1187_v20 }
  0x44   : > { %393 = vst.msk [vmem:[#allocation2 + $0x50] sm:$0xff] %vm382_vm0, %v1187_v20 }
  0x45   : > { %394 = vst.msk [vmem:[#allocation2 + $0x58] sm:$0xff] %vm382_vm0, %v1187_v20 }
  0x46   : > { %554 = vmatpush.bf16.msra.mxu0 %v1349_v38  ;;  %395 = vst.msk [vmem:[#allocation2 + $0x60] sm:$0xff] %vm382_vm0, %v1187_v20 }
  0x47   : > { %567 = vmatpush.bf16.msra.mxu1 %v1352_v39  ;;  %396 = vst.msk [vmem:[#allocation2 + $0x68] sm:$0xff] %vm382_vm0, %v1187_v20 }
  0x48   : > { %397 = vst.msk [vmem:[#allocation2 + $0x70] sm:$0xff] %vm382_vm0, %v1187_v20  ;;  %v626_v47 = vld [vmem:[#allocation2 + $0x38] sm:$0xff] }
  0x49   : > { %398 = vst.msk [vmem:[#allocation2 + $0x78] sm:$0xff] %vm382_vm0, %v1187_v20 }
  0x4a   : > { %555 = vmatpush.bf16.msra.mxu0 %v1357_v40  ;;  %399 = vst.msk [vmem:[#allocation2 + $0x80] sm:$0xff] %vm382_vm0, %v1187_v20 }
  0x4b   : > { %568 = vmatpush.bf16.msra.mxu1 %v1360_v41  ;;  %400 = vst.msk [vmem:[#allocation2 + $0x88] sm:$0xff] %vm382_vm0, %v1187_v20 }
  0x4c   : > { %401 = vst.msk [vmem:[#allocation2 + $0x90] sm:$0xff] %vm382_vm0, %v1187_v20 }
  0x4d   : > { %402 = vst.msk [vmem:[#allocation2 + $0x98] sm:$0xff] %vm382_vm0, %v1187_v20  ;;  %v631_v24 = vld [vmem:[#allocation2 + $0x60] sm:$0xff] }
  0x4e   : > { %556 = vmatpush.bf16.msra.mxu0 %v1365_v42  ;;  %403 = vst.msk [vmem:[#allocation2 + $0xa0] sm:$0xff] %vm382_vm0, %v1187_v20  ;;  %v632_v31 = vld [vmem:[#allocation2 + $0x68] sm:$0xff] }
  0x4f   : > { %569 = vmatpush.bf16.msra.mxu1 %v1368_v43  ;;  %404 = vst.msk [vmem:[#allocation2 + $0xa8] sm:$0xff] %vm382_vm0, %v1187_v20 }
  0x50   : > { %405 = vst.msk [vmem:[#allocation2 + $0xb0] sm:$0xff] %vm382_vm0, %v1187_v20 }
  0x51   : > { %406 = vst.msk [vmem:[#allocation2 + $0xb8] sm:$0xff] %vm382_vm0, %v1187_v20 }
  0x52   : > { %557 = vmatpush.bf16.msra.mxu0 %v1373_v44  ;;  %407 = vst.msk [vmem:[#allocation2 + $0xc0] sm:$0xff] %vm382_vm0, %v1187_v20 }
  0x53   : > { %570 = vmatpush.bf16.msra.mxu1 %v1376_v45  ;;  %408 = vst.msk [vmem:[#allocation2 + $0xc8] sm:$0xff] %vm382_vm0, %v1187_v20 }
  0x54   : > { %409 = vst.msk [vmem:[#allocation2 + $0xd0] sm:$0xff] %vm382_vm0, %v1187_v20 }
  0x55   : > { %410 = vst.msk [vmem:[#allocation2 + $0xd8] sm:$0xff] %vm382_vm0, %v1187_v20 }
  0x56   : > { %558 = vmatpush.bf16.msra.mxu0 %v1384_v49  ;;  %411 = vst.msk [vmem:[#allocation2 + $0xe0] sm:$0xff] %vm382_vm0, %v1187_v20 }
  0x57   : > { %571 = vmatpush.bf16.msra.mxu1 %v1387_v50  ;;  %412 = vst.msk [vmem:[#allocation2 + $0xe8] sm:$0xff] %vm382_vm0, %v1187_v20 }
  0x58   : > { %413 = vst.msk [vmem:[#allocation2 + $0xf0] sm:$0xff] %vm382_vm0, %v1187_v20 }
  0x59   : > { %559 = vmatmul.bf16.vlgmr.msra.gmra.mxu0 %v451_v51  ;;  %414 = vst.msk [vmem:[#allocation2 + $0xf8] sm:$0xff] %vm382_vm0, %v1187_v20  ;;  %v634_v51 = vld [vmem:[#allocation2 + $0x78] sm:$0xff] }
  0x5a   : > { %572 = vmatmul.bf16.vlgmr.msra.gmra.mxu1 %v452_v52  ;;  %v623_v52 = vld [vmem:[#allocation2 + $0x20] sm:$0xff] }
  0xd6   : > { %v560_v53 = vpop.f32.mrf.mxu0 }
  0xd7   : > { %v573_v54 = vpop.f32.mrf.mxu1 }
  0xd8   : > { %v574_v56 = vadd.f32 %v573_v54, %v560_v53 }
  0xda   : > { %v578_v57 = vmul.f32 %v577_v55, %v574_v56 }
  0xdc   : > { %579 = vxpose.xlu0.b32.start.end [1/1] (short) %v578_v57, 128  ;;  %v627_v57 = vld [vmem:[#allocation2 + $0x40] sm:$0xff] }
  0xde   : > { %v562_v58 = vpop.f32.mrf.mxu0 }
  0xdf   : > { %v575_v59 = vpop.f32.mrf.mxu1 }
 0x180   : > { %v595_v60 = vpop.trf.xlu0 }
 0x188   : > { %v596_v61 = vpop.trf.xlu0 }
 0x189   : > { %v611_v62 = vpack.c.bf16 %v596_v61, %v595_v60  ;;  %v635_v61 = vld [vmem:[#allocation2 + $0x80] sm:$0xff] }
 0x190   : > { %v597_v63 = vpop.trf.xlu0 }
 0x198   : > { %v598_v0 = vpop.trf.xlu0 }
 0x199   : > { %v612_v1 = vpack.c.bf16 %v598_v0, %v597_v63 }
 0x1a0   : > { %v599_v2 = vpop.trf.xlu0 }
 0x1a8   : > { %v600_v3 = vpop.trf.xlu0 }
 0x1a9   : > { %v613_v4 = vpack.c.bf16 %v600_v3, %v599_v2  ;;  %v628_v3 = vld [vmem:[#allocation2 + $0x48] sm:$0xff] }
 0x1b0   : > { %v601_v5 = vpop.trf.xlu0 }
 0x1b8   : > { %v602_v6 = vpop.trf.xlu0 }
 0x1b9   : > { %v614_v7 = vpack.c.bf16 %v602_v6, %v601_v5 }
 0x1c0   : > { %v603_v8 = vpop.trf.xlu0 }
 0x1c8   : > { %v604_v9 = vpop.trf.xlu0 }
 0x1c9   : > { %v615_v19 = vpack.c.bf16 %v604_v9, %v603_v8 }
 0x1d0   : > { %v605_v10 = vpop.trf.xlu0 }
 0x1d8   : > { %v606_v11 = vpop.trf.xlu0 }
 0x1d9   : > { %v616_v18 = vpack.c.bf16 %v606_v11, %v605_v10 }
 0x1e0   : > { %v607_v12 = vpop.trf.xlu0 }
 0x1e8   : > { %v608_v13 = vpop.trf.xlu0 }
 0x1e9   : > { %v617_v17 = vpack.c.bf16 %v608_v13, %v607_v12  ;;  %v629_v12 = vld [vmem:[#allocation2 + $0x50] sm:$0xff] }
 0x1f0   : > { %v609_v14 = vpop.trf.xlu0 }
 0x1f8   : > { %v610_v15 = vpop.trf.xlu0 }
 0x1f9   : > { %v618_v16 = vpack.c.bf16 %v610_v15, %v609_v14  ;;  %v641_v15 = vld [vmem:[#allocation2 + $0xb0] sm:$0xff] }
 0x1fb   : > { %651 = vmatpush.bf16.msrb.mxu0 %v618_v16  ;;  %1082 = vmatpush.bf16.msrb.mxu1 %v618_v16 }
 0x1fc   : > { %1083 = vmatpush.bf16.msra.mxu2 %v618_v16  ;;  %1084 = vmatpush.bf16.msra.mxu3 %v618_v16 }
 0x1ff   : > { %652 = vmatpush.bf16.msrb.mxu0 %v617_v17  ;;  %1085 = vmatpush.bf16.msrb.mxu1 %v617_v17 }
 0x200   : > { %1086 = vmatpush.bf16.msra.mxu2 %v617_v17  ;;  %1087 = vmatpush.bf16.msra.mxu3 %v617_v17 }
 0x203   : > { %653 = vmatpush.bf16.msrb.mxu0 %v616_v18  ;;  %1088 = vmatpush.bf16.msrb.mxu1 %v616_v18 }
 0x204   : > { %1089 = vmatpush.bf16.msra.mxu2 %v616_v18  ;;  %1090 = vmatpush.bf16.msra.mxu3 %v616_v18  ;;  %v637_v18 = vld [vmem:[#allocation2 + $0x90] sm:$0xff] }
 0x207   : > { %654 = vmatpush.bf16.msrb.mxu0 %v615_v19  ;;  %1091 = vmatpush.bf16.msrb.mxu1 %v615_v19 }
 0x208   : > { %1092 = vmatpush.bf16.msra.mxu2 %v615_v19  ;;  %1093 = vmatpush.bf16.msra.mxu3 %v615_v19  ;;  %v642_v19 = vld [vmem:[#allocation2 + $0xb8] sm:$0xff] }
 0x20b   : > { %655 = vmatpush.bf16.msrb.mxu0 %v614_v7  ;;  %1094 = vmatpush.bf16.msrb.mxu1 %v614_v7 }
 0x20c   : > { %1095 = vmatpush.bf16.msra.mxu2 %v614_v7  ;;  %1096 = vmatpush.bf16.msra.mxu3 %v614_v7  ;;  %v636_v7 = vld [vmem:[#allocation2 + $0x88] sm:$0xff] }
 0x20f   : > { %656 = vmatpush.bf16.msrb.mxu0 %v613_v4  ;;  %1097 = vmatpush.bf16.msrb.mxu1 %v613_v4 }
 0x210   : > { %1098 = vmatpush.bf16.msra.mxu2 %v613_v4  ;;  %1099 = vmatpush.bf16.msra.mxu3 %v613_v4 }
 0x213   : > { %657 = vmatpush.bf16.msrb.mxu0 %v612_v1  ;;  %1100 = vmatpush.bf16.msrb.mxu1 %v612_v1 }
 0x214   : > { %1101 = vmatpush.bf16.msra.mxu2 %v612_v1  ;;  %1102 = vmatpush.bf16.msra.mxu3 %v612_v1 }
 0x217   : > { %658 = vmatpush.bf16.msrb.mxu0 %v611_v62  ;;  %1103 = vmatpush.bf16.msrb.mxu1 %v611_v62 }
 0x218   : > { %1104 = vmatpush.bf16.msra.mxu2 %v611_v62  ;;  %1105 = vmatpush.bf16.msra.mxu3 %v611_v62  ;;  %v624_v62 = vld [vmem:[#allocation2 + $0x28] sm:$0xff] }
 0x21a   : > { %659 = vmatmul.bf16.vlgmr.msrb.gmra.mxu0 %v1384_v49  ;;  %674 = vmatmul.bf16.vlgmr.msrb.gmra.mxu1 %v1357_v40 }
 0x21b   : > { %689 = vmatmul.bf16.vlgmr.msra.gmra.mxu2 %v1333_v34  ;;  %714 = vmatmul.bf16.vlgmr.msra.gmra.mxu3 %v1360_v41  ;;  %v633_v41 = vld [vmem:[#allocation2 + $0x70] sm:$0xff] }
 0x22a   : > { %664 = vmatmul.bf16.gmra.mxu0 %v1373_v44  ;;  %679 = vmatmul.bf16.gmra.mxu1 %v1349_v38 }
 0x22b   : > { %694 = vmatmul.bf16.gmra.mxu2 %v1325_v32  ;;  %719 = vmatmul.bf16.gmra.mxu3 %v1352_v39  ;;  %v621_v32 = vld [vmem:[#allocation2 + $0x10] sm:$0xff] }
 0x23a   : > { %669 = vmatmul.bf16.gmra.mxu0 %v1365_v42  ;;  %684 = vmatmul.bf16.gmra.mxu1 %v1341_v36  ;;  %v622_v42 = vld [vmem:[#allocation2 + $0x18] sm:$0xff] }
 0x23b   : > { %699 = vmatmul.bf16.gmra.mxu2 %v1387_v50  ;;  %724 = vmatmul.bf16.gmra.mxu3 %v1344_v37  ;;  %v625_v37 = vld [vmem:[#allocation2 + $0x30] sm:$0xff] }
 0x24b   : > { %704 = vmatmul.bf16.gmra.mxu2 %v1376_v45  ;;  %729 = vmatmul.bf16.gmra.mxu3 %v1336_v35 }
 0x25b   : > { %709 = vmatmul.bf16.gmra.mxu2 %v1368_v43  ;;  %734 = vmatmul.bf16.gmra.mxu3 %v1328_v33 }
 0x297   : > { %v660_v22 = vpop.f32.mrf.mxu0  ;;  %v675_v38 = vpop.f32.mrf.mxu1 }
 0x298   : > { %v740_v23 = vadd.f32 %v660_v22, %v619_v21  ;;  %v746_v40 = vadd.f32 %v675_v38, %v625_v37  ;;  %v630_v22 = vld [vmem:[#allocation2 + $0x58] sm:$0xff]  ;;  %v639_v37 = vld [vmem:[#allocation2 + $0xa0] sm:$0xff]  ;;  %v644_v38 = vld [vmem:[#allocation2 + $0xc8] sm:$0xff] }
 0x29a   : > { %773 = vst.msk [vmem:[#allocation2] sm:$0xff] %vm382_vm0, %v740_v23 }
 0x29b   : > { %779 = vst.msk [vmem:[#allocation2 + $0x30] sm:$0xff] %vm382_vm0, %v746_v40 }
 0x29e   : > { %v690_v26 = vpop.f32.mrf.mxu2  ;;  %v715_v9 = vpop.f32.mrf.mxu3 }
 0x29f   : > { %v752_v27 = vadd.f32 %v690_v26, %v631_v24  ;;  %v662_v28 = vpop.f32.mrf.mxu0  ;;  %v677_v48 = vpop.f32.mrf.mxu1  ;;  %v762_v17 = vadd.f32 %v715_v9, %v641_v15  ;;  %v650_v9 = vld [vmem:[#allocation2 + $0xf8] sm:$0xff] }
 0x2a0   : > { %v741_v29 = vadd.f32 %v662_v28, %v620_v25  ;;  %v747_v50 = vadd.f32 %v677_v48, %v626_v47 }
 0x2a1   : > { %785 = vst.msk [vmem:[#allocation2 + $0x60] sm:$0xff] %vm382_vm0, %v752_v27  ;;  %v808_v30 = vld [vmem:[#allocation2] sm:$0xff] }
 0x2a2   : > { %774 = vst.msk [vmem:[#allocation2 + $0x8] sm:$0xff] %vm382_vm0, %v741_v29  ;;  %840 = vxpose.xlu0.b32.start [1/16] (narrow) %v808_v30, 8  ;;  %v814_v24 = vld [vmem:[#allocation2 + $0x30] sm:$0xff]  ;;  %v638_v29 = vld [vmem:[#allocation2 + $0x98] sm:$0xff]  ;;  %v643_v30 = vld [vmem:[#allocation2 + $0xc0] sm:$0xff] }
 0x2a3   : > { %780 = vst.msk [vmem:[#allocation2 + $0x38] sm:$0xff] %vm382_vm0, %v747_v50 }
 0x2a4   : > { %795 = vst.msk [vmem:[#allocation2 + $0xb0] sm:$0xff] %vm382_vm0, %v762_v17 }
 0x2a6   : > { %v692_v33 = vpop.f32.mrf.mxu2  ;;  %v717_v21 = vpop.f32.mrf.mxu3 }
 0x2a7   : > { %v753_v34 = vadd.f32 %v692_v33, %v632_v31  ;;  %v665_v35 = vpop.f32.mrf.mxu0  ;;  %v680_v58 = vpop.f32.mrf.mxu1  ;;  %v763_v25 = vadd.f32 %v717_v21, %v642_v19 }
 0x2a8   : > { %v742_v36 = vadd.f32 %v665_v35, %v621_v32  ;;  %v748_v60 = vadd.f32 %v680_v58, %v627_v57  ;;  %v647_v58 = vld [vmem:[#allocation2 + $0xe0] sm:$0xff] }
 0x2a9   : > { %786 = vst.msk [vmem:[#allocation2 + $0x68] sm:$0xff] %vm382_vm0, %v753_v34  ;;  %v809_v39 = vld [vmem:[#allocation2 + $0x8] sm:$0xff] }
 0x2aa   : > { %775 = vst.msk [vmem:[#allocation2 + $0x10] sm:$0xff] %vm382_vm0, %v742_v36  ;;  %841 = vxpose.xlu0.b32.cont [2/16] (narrow) %v809_v39, 8  ;;  %v815_v34 = vld [vmem:[#allocation2 + $0x38] sm:$0xff] }
 0x2ab   : > { %781 = vst.msk [vmem:[#allocation2 + $0x40] sm:$0xff] %vm382_vm0, %v748_v60 }
 0x2ac   : > { %796 = vst.msk [vmem:[#allocation2 + $0xb8] sm:$0xff] %vm382_vm0, %v763_v25 }
 0x2ae   : > { %v695_v43 = vpop.f32.mrf.mxu2  ;;  %v720_v32 = vpop.f32.mrf.mxu3 }
 0x2af   : > { %v754_v44 = vadd.f32 %v695_v43, %v633_v41  ;;  %v667_v45 = vpop.f32.mrf.mxu0  ;;  %v682_v4 = vpop.f32.mrf.mxu1  ;;  %v764_v35 = vadd.f32 %v720_v32, %v643_v30 }
 0x2b0   : > { %v743_v46 = vadd.f32 %v667_v45, %v622_v42  ;;  %v749_v6 = vadd.f32 %v682_v4, %v628_v3  ;;  %v640_v45 = vld [vmem:[#allocation2 + $0xa8] sm:$0xff]  ;;  %v820_v3 = vld [vmem:[#allocation2 + $0x60] sm:$0xff]  ;;  %v649_v4 = vld [vmem:[#allocation2 + $0xf0] sm:$0xff] }
 0x2b1   : > { %787 = vst.msk [vmem:[#allocation2 + $0x70] sm:$0xff] %vm382_vm0, %v754_v44  ;;  %v810_v49 = vld [vmem:[#allocation2 + $0x10] sm:$0xff] }
 0x2b2   : > { %776 = vst.msk [vmem:[#allocation2 + $0x18] sm:$0xff] %vm382_vm0, %v743_v46  ;;  %842 = vxpose.xlu0.b32.cont [3/16] (narrow) %v810_v49, 8  ;;  %v816_v42 = vld [vmem:[#allocation2 + $0x40] sm:$0xff]  ;;  %v645_v46 = vld [vmem:[#allocation2 + $0xd0] sm:$0xff] }
 0x2b3   : > { %782 = vst.msk [vmem:[#allocation2 + $0x48] sm:$0xff] %vm382_vm0, %v749_v6 }
 0x2b4   : > { %797 = vst.msk [vmem:[#allocation2 + $0xc0] sm:$0xff] %vm382_vm0, %v764_v35 }
 0x2b6   : > { %v697_v53 = vpop.f32.mrf.mxu2  ;;  %v722_v40 = vpop.f32.mrf.mxu3 }
 0x2b7   : > { %v755_v54 = vadd.f32 %v697_v53, %v634_v51  ;;  %v670_v55 = vpop.f32.mrf.mxu0  ;;  %v685_v13 = vpop.f32.mrf.mxu1  ;;  %v765_v43 = vadd.f32 %v722_v40, %v644_v38  ;;  %v646_v53 = vld [vmem:[#allocation2 + $0xd8] sm:$0xff] }
 0x2b8   : > { %v744_v56 = vadd.f32 %v670_v55, %v623_v52  ;;  %v750_v16 = vadd.f32 %v685_v13, %v629_v12  ;;  %v822_v13 = vld [vmem:[#allocation2 + $0x70] sm:$0xff] }
 0x2b9   : > { %788 = vst.msk [vmem:[#allocation2 + $0x78] sm:$0xff] %vm382_vm0, %v755_v54  ;;  %v811_v59 = vld [vmem:[#allocation2 + $0x18] sm:$0xff] }
 0x2ba   : > { %777 = vst.msk [vmem:[#allocation2 + $0x20] sm:$0xff] %vm382_vm0, %v744_v56  ;;  %843 = vxpose.xlu0.b32.cont [4/16] (narrow) %v811_v59, 8  ;;  %v817_v50 = vld [vmem:[#allocation2 + $0x48] sm:$0xff]  ;;  %v830_v59 = vld [vmem:[#allocation2 + $0xb0] sm:$0xff] }
 0x2bb   : > { %783 = vst.msk [vmem:[#allocation2 + $0x50] sm:$0xff] %vm382_vm0, %v750_v16 }
 0x2bc   : > { %798 = vst.msk [vmem:[#allocation2 + $0xc8] sm:$0xff] %vm382_vm0, %v765_v43 }
 0x2be   : > { %v700_v63 = vpop.f32.mrf.mxu2  ;;  %v725_v48 = vpop.f32.mrf.mxu3 }
 0x2bf   : > { %v756_v0 = vadd.f32 %v700_v63, %v635_v61  ;;  %v672_v1 = vpop.f32.mrf.mxu0  ;;  %v687_v27 = vpop.f32.mrf.mxu1  ;;  %v766_v51 = vadd.f32 %v725_v48, %v645_v46  ;;  %v648_v63 = vld [vmem:[#allocation2 + $0xe8] sm:$0xff] }
 0x2c0   : > { %v745_v2 = vadd.f32 %v672_v1, %v624_v62  ;;  %v751_v28 = vadd.f32 %v687_v27, %v630_v22  ;;  %v823_v15 = vld [vmem:[#allocation2 + $0x78] sm:$0xff] }
 0x2c1   : > { %789 = vst.msk [vmem:[#allocation2 + $0x80] sm:$0xff] %vm382_vm0, %v756_v0  ;;  %v812_v5 = vld [vmem:[#allocation2 + $0x20] sm:$0xff] }
 0x2c2   : > { %778 = vst.msk [vmem:[#allocation2 + $0x28] sm:$0xff] %vm382_vm0, %v745_v2  ;;  %844 = vxpose.xlu0.b32.cont [5/16] (narrow) %v812_v5, 8  ;;  %v818_v55 = vld [vmem:[#allocation2 + $0x50] sm:$0xff]  ;;  %v831_v2 = vld [vmem:[#allocation2 + $0xb8] sm:$0xff]  ;;  %v832_v5 = vld [vmem:[#allocation2 + $0xc0] sm:$0xff] }
 0x2c3   : > { %784 = vst.msk [vmem:[#allocation2 + $0x58] sm:$0xff] %vm382_vm0, %v751_v28  ;;  %v833_v12 = vld [vmem:[#allocation2 + $0xc8] sm:$0xff] }
 0x2c4   : > { %799 = vst.msk [vmem:[#allocation2 + $0xd0] sm:$0xff] %vm382_vm0, %v766_v51 }
 0x2c6   : > { %v702_v8 = vpop.f32.mrf.mxu2  ;;  %v727_v54 = vpop.f32.mrf.mxu3 }
 0x2c7   : > { %v757_v10 = vadd.f32 %v702_v8, %v636_v7  ;;  %v767_v56 = vadd.f32 %v727_v54, %v646_v53  ;;  %v821_v8 = vld [vmem:[#allocation2 + $0x68] sm:$0xff] }
 0x2c8   : > { %v824_v11 = vld [vmem:[#allocation2 + $0x80] sm:$0xff] }
 0x2c9   : > { %790 = vst.msk [vmem:[#allocation2 + $0x88] sm:$0xff] %vm382_vm0, %v757_v10  ;;  %872 = vxpose.xlu1.b32.start [1/16] (narrow) %v824_v11, 8  ;;  %v813_v14 = vld [vmem:[#allocation2 + $0x28] sm:$0xff] }
 0x2ca   : > { %845 = vxpose.xlu0.b32.cont [6/16] (narrow) %v813_v14, 8  ;;  %800 = vst.msk [vmem:[#allocation2 + $0xd8] sm:$0xff] %vm382_vm0, %v767_v56  ;;  %v819_v61 = vld [vmem:[#allocation2 + $0x58] sm:$0xff] }
 0x2cb   : > { %v834_v14 = vld [vmem:[#allocation2 + $0xd0] sm:$0xff] }
 0x2ce   : > { %v705_v20 = vpop.f32.mrf.mxu2  ;;  %v730_v60 = vpop.f32.mrf.mxu3 }
 0x2cf   : > { %v758_v23 = vadd.f32 %v705_v20, %v637_v18  ;;  %v768_v62 = vadd.f32 %v730_v60, %v647_v58 }
 0x2d0   : > { %v825_v26 = vld [vmem:[#allocation2 + $0x88] sm:$0xff] }
 0x2d1   : > { %791 = vst.msk [vmem:[#allocation2 + $0x90] sm:$0xff] %vm382_vm0, %v758_v23  ;;  %873 = vxpose.xlu1.b32.cont [2/16] (narrow) %v825_v26, 8  ;;  %v835_v16 = vld [vmem:[#allocation2 + $0xd8] sm:$0xff] }
 0x2d2   : > { %846 = vxpose.xlu0.b32.cont [7/16] (narrow) %v814_v24, 8  ;;  %801 = vst.msk [vmem:[#allocation2 + $0xe0] sm:$0xff] %vm382_vm0, %v768_v62 }
 0x2d6   : > { %v707_v31 = vpop.f32.mrf.mxu2  ;;  %v732_v0 = vpop.f32.mrf.mxu3 }
 0x2d7   : > { %v759_v33 = vadd.f32 %v707_v31, %v638_v29  ;;  %v769_v1 = vadd.f32 %v732_v0, %v648_v63 }
 0x2d8   : > { %v826_v36 = vld [vmem:[#allocation2 + $0x90] sm:$0xff] }
 0x2d9   : > { %792 = vst.msk [vmem:[#allocation2 + $0x98] sm:$0xff] %vm382_vm0, %v759_v33  ;;  %874 = vxpose.xlu1.b32.cont [3/16] (narrow) %v826_v36, 8  ;;  %v836_v17 = vld [vmem:[#allocation2 + $0xe0] sm:$0xff] }
 0x2da   : > { %847 = vxpose.xlu0.b32.cont [8/16] (narrow) %v815_v34, 8  ;;  %802 = vst.msk [vmem:[#allocation2 + $0xe8] sm:$0xff] %vm382_vm0, %v769_v1 }
 0x2de   : > { %v710_v39 = vpop.f32.mrf.mxu2  ;;  %v735_v6 = vpop.f32.mrf.mxu3 }
 0x2df   : > { %v760_v41 = vadd.f32 %v710_v39, %v639_v37  ;;  %v770_v7 = vadd.f32 %v735_v6, %v649_v4 }
 0x2e0   : > { %v827_v44 = vld [vmem:[#allocation2 + $0x98] sm:$0xff] }
 0x2e1   : > { %793 = vst.msk [vmem:[#allocation2 + $0xa0] sm:$0xff] %vm382_vm0, %v760_v41  ;;  %875 = vxpose.xlu1.b32.cont [4/16] (narrow) %v827_v44, 8  ;;  %v837_v18 = vld [vmem:[#allocation2 + $0xe8] sm:$0xff] }
 0x2e2   : > { %848 = vxpose.xlu0.b32.cont [9/16] (narrow) %v816_v42, 8  ;;  %803 = vst.msk [vmem:[#allocation2 + $0xf0] sm:$0xff] %vm382_vm0, %v770_v7 }
 0x2e6   : > { %v712_v47 = vpop.f32.mrf.mxu2  ;;  %v737_v10 = vpop.f32.mrf.mxu3 }
 0x2e7   : > { %v761_v49 = vadd.f32 %v712_v47, %v640_v45  ;;  %v771_v11 = vadd.f32 %v737_v10, %v650_v9 }
 0x2e8   : > { %v828_v52 = vld [vmem:[#allocation2 + $0xa0] sm:$0xff] }
 0x2e9   : > { %794 = vst.msk [vmem:[#allocation2 + $0xa8] sm:$0xff] %vm382_vm0, %v761_v49  ;;  %876 = vxpose.xlu1.b32.cont [5/16] (narrow) %v828_v52, 8  ;;  %v838_v19 = vld [vmem:[#allocation2 + $0xf0] sm:$0xff] }
 0x2ea   : > { %849 = vxpose.xlu0.b32.cont [10/16] (narrow) %v817_v50, 8  ;;  %804 = vst.msk [vmem:[#allocation2 + $0xf8] sm:$0xff] %vm382_vm0, %v771_v11 }
 0x2f0   : > { %v829_v57 = vld [vmem:[#allocation2 + $0xa8] sm:$0xff] }
 0x2f1   : > { %877 = vxpose.xlu1.b32.cont [6/16] (narrow) %v829_v57, 8  ;;  %v839_v20 = vld [vmem:[#allocation2 + $0xf8] sm:$0xff] }
 0x2f2   : > { %850 = vxpose.xlu0.b32.cont [11/16] (narrow) %v818_v55, 8 }
 0x2f9   : > { %878 = vxpose.xlu1.b32.cont [7/16] (narrow) %v830_v59, 8 }
 0x2fa   : > { %851 = vxpose.xlu0.b32.cont [12/16] (narrow) %v819_v61, 8 }
 0x301   : > { %879 = vxpose.xlu1.b32.cont [8/16] (narrow) %v831_v2, 8 }
 0x302   : > { %852 = vxpose.xlu0.b32.cont [13/16] (narrow) %v820_v3, 8 }
 0x309   : > { %880 = vxpose.xlu1.b32.cont [9/16] (narrow) %v832_v5, 8 }
 0x30a   : > { %853 = vxpose.xlu0.b32.cont [14/16] (narrow) %v821_v8, 8 }
 0x311   : > { %881 = vxpose.xlu1.b32.cont [10/16] (narrow) %v833_v12, 8 }
 0x312   : > { %854 = vxpose.xlu0.b32.cont [15/16] (narrow) %v822_v13, 8 }
 0x319   : > { %882 = vxpose.xlu1.b32.cont [11/16] (narrow) %v834_v14, 8 }
 0x31a   : > { %855 = vxpose.xlu0.b32.end [16/16] (narrow) %v823_v15, 8 }
 0x321   : > { %883 = vxpose.xlu1.b32.cont [12/16] (narrow) %v835_v16, 8 }
 0x329   : > { %884 = vxpose.xlu1.b32.cont [13/16] (narrow) %v836_v17, 8 }
 0x331   : > { %885 = vxpose.xlu1.b32.cont [14/16] (narrow) %v837_v18, 8 }
 0x339   : > { %886 = vxpose.xlu1.b32.cont [15/16] (narrow) %v838_v19, 8 }
 0x341   : > { %887 = vxpose.xlu1.b32.end [16/16] (narrow) %v839_v20, 8 }
 0x346   : > { %v856_v21 = vpop.trf.xlu0 }
 0x347   : > { %904 = vst [vmem:[%s377_s18] sm:$0xff] %v856_v21 }
 0x36d   : > { %v888_v22 = vpop.trf.xlu1 }
 0x36e   : > { %905 = vst [vmem:[%s377_s18 + $0x8] sm:$0xff] %v888_v22 }
 0x36f PF: > { %s13_s16 = sadd.s32 1, %s1185_s16   ;;  %s1502_s12 = smov %s1173_s13 }
 0x370   : > { %p10_p10 = scmp.ge.s32.totalorder %s13_s16, 4   ;;  %s1503_s13 = smov %s1243_s20 }
 0x371   : > { %s1504_s14 = smov %s1181_s15  ;;  %s1505_s15 = smov %s1507_s17 }
 0x372   :  { %12 = sbr.rel (!%p10_p10) target bundleno = 3 (0x3), region = 119 }

</bundles_post_ra>
